<compile_context>
chip_gen: v6e
topology: v6e:2x2x1
jax: 0.10.0
libtpu: 0.0.40
codegen_flags: <defaults>
</compile_context>

<pallas_src>
import jax
import jax.numpy as jnp
from jax.experimental import pallas as pl
from jax.experimental.pallas import tpu as pltpu


def _cast_kernel(x_ref, o_ref):
    # Widening cast (e.g. bf16 -> f32); pure VPU work, memory bound.
    o_ref[...] = x_ref[...].astype(o_ref.dtype)


def _sublane_multiple(dtype) -> int:
    # Sublane packing: f32 -> 8 rows/vreg, bf16 -> 16, int8/fp8 -> 32.
    itemsize = jnp.dtype(dtype).itemsize
    return max(8, 32 // itemsize)


def _tile_budget_bytes() -> int:
    """Per-block byte budget of the widest operand, by TPU generation."""
    try:
        kind = jax.devices()[0].device_kind.lower()
    except Exception:  # pragma: no cover - defensive only
        kind = ""
    if "v5" in kind:
        return 4 << 20    # ~820 GB/s HBM: 4 MiB already amortizes per-step cost
    if "v6" in kind:
        return 12 << 20   # 128 MiB VMEM, 1.4 TB/s: bigger tiles shave step overhead
    return 8 << 20        # v7x / unknown: 64 MiB VMEM per TC, 3.2 TB/s HBM


def _choose_lane_dense_2d(total: int, fallback_cols: int):
    """Pick (rows, cols) with cols a large multiple of 128 whenever possible."""
    if total <= 0:
        return 0, max(1, fallback_cols)
    cols_cap = 32768
    if total % 128 == 0:
        t = total // 128
        max_mult = min(t, cols_cap // 128)
        # Largest divisor of total that is a multiple of 128 and <= cols_cap.
        for m in range(max_mult, 0, -1):
            if t % m == 0:
                cols = 128 * m
                return total // cols, cols
    # Awkward sizes: fall back to the original trailing dim (correct, just not
    # lane-dense -> masked partial stores).
    if fallback_cols > 0 and total % fallback_cols == 0:
        return total // fallback_cols, fallback_cols
    return total, 1  # last resort


def _pick_tile_rows(rows, cols, in_item, out_item, sublane, budget_bytes,
                    min_steps=4):
    """Budget-sized tile rows, kept a multiple of the sublane packing and
    capped so the grid gets several parallel steps (megacore on v7x)."""
    widest = max(in_item, out_item)
    rows_by_budget = max(
        sublane, (budget_bytes // max(1, cols * widest)) // sublane * sublane
    )
    if rows <= sublane:
        return rows  # full extent is always a legal block shape
    rows_for_steps = pl.cdiv(rows, min_steps)
    rows_for_steps = max(
        sublane, (rows_for_steps + sublane - 1) // sublane * sublane
    )
    tile_rows = min(rows_by_budget, rows_for_steps, rows)
    if tile_rows != rows:
        tile_rows = max(sublane, tile_rows // sublane * sublane)
    return tile_rows


# Below this many bytes of the widest operand, XLA's fused convert beats a
# standalone Pallas launch (per-step overhead ~0.35 us + launch overhead).
_SMALL_BYPASS_BYTES = 1 << 20


def _pallas_cast(x, out_dtype):
    """Layout-preserving dtype cast via a tiled, lane-dense Pallas kernel."""
    out_dtype = jnp.dtype(out_dtype)
    if x.dtype == out_dtype:
        # Identity: never launch a kernel for a no-op.
        return x

    total = int(x.size)
    in_item = jnp.dtype(x.dtype).itemsize
    out_item = out_dtype.itemsize
    widest = max(in_item, out_item)

    if total == 0 or total * widest < _SMALL_BYPASS_BYTES:
        # Tiny-tensor bypass: plain convert, no HBM-round-trip kernel.
        return x.astype(out_dtype)

    orig_shape = x.shape
    fallback_cols = orig_shape[-1] if x.ndim >= 1 else 1
    rows, cols = _choose_lane_dense_2d(total, fallback_cols)
    x2d = x.reshape(rows, cols)

    sublane = max(_sublane_multiple(x.dtype), _sublane_multiple(out_dtype))
    budget_bytes = _tile_budget_bytes()
    tile_rows = _pick_tile_rows(rows, cols, in_item, out_item, sublane,
                                budget_bytes, min_steps=4)

    grid = (pl.cdiv(rows, tile_rows),)
    bytes_accessed = total * (in_item + out_item)

    # Double-buffered input + output tiles, with ~25% headroom for compiler
    # scratch; never request the full physical VMEM (v7x has only 64 MiB/TC).
    tile_bytes = tile_rows * cols * (in_item + out_item)
    vmem_bytes = min(48 << 20, max(4 << 20, int(2 * tile_bytes * 1.25)))

    out2d = pl.pallas_call(
        _cast_kernel,
        out_shape=jax.ShapeDtypeStruct((rows, cols), out_dtype),
        grid_spec=pltpu.PrefetchScalarGridSpec(
            num_scalar_prefetch=0,
            grid=grid,
            in_specs=[pl.BlockSpec((tile_rows, cols), lambda i: (i, 0))],
            out_specs=pl.BlockSpec((tile_rows, cols), lambda i: (i, 0)),
        ),
        compiler_params=pltpu.CompilerParams(
            dimension_semantics=("parallel",),
            vmem_limit_bytes=vmem_bytes,
        ),
        cost_estimate=pl.CostEstimate(
            flops=0, transcendentals=0, bytes_accessed=bytes_accessed
        ),
    )(x2d)

    return out2d.reshape(orig_shape)


def encoder_decoder_forward(x, encoder=None, decoder=None, *,
                            fuse_cast_into_encoder=True):
    """JAX/Pallas equivalent of EncoderDecoder.forward."""
    # torch.unsqueeze(x, dim=1): metadata-only, no kernel needed.
    x = jnp.expand_dims(x, axis=1)
    # x.double(): TPU has no native float64; promote to float32 instead.
    # TODO(synk): float64 is unsupported on TPU vector units; float32 is used.
    if encoder is not None and fuse_cast_into_encoder:
        # Structural win (perf review): when an encoder follows, do NOT
        # materialize the f32 copy in HBM -- let XLA fuse the convert into the
        # encoder's first consumer (MXU encoders take bf16 natively anyway).
        x = x.astype(jnp.float32)
    else:
        x = _pallas_cast(x, jnp.float32)
    # TODO(synk): encoder/decoder are injected submodules with no definition
    # in the spec; they default to identity pass-throughs here.
    enc_outputs = encoder(x) if encoder is not None else x
    dec_outputs = decoder(enc_outputs) if decoder is not None else enc_outputs
    return dec_outputs


if __name__ == "__main__":
    key = jax.random.PRNGKey(0)

    # (1) Input large enough to exercise the Pallas cast kernel (above the
    #     tiny-tensor bypass): (batch=2, H=512, W=1024) bf16 -> 4 MiB of f32.
    x_big = jax.random.normal(key, (2, 512, 1024), dtype=jnp.bfloat16)
    y_big = jax.block_until_ready(encoder_decoder_forward(x_big))
    expected_big = jnp.expand_dims(x_big, axis=1).astype(jnp.float32)
    assert y_big.shape == (2, 1, 512, 1024), y_big.shape
    assert y_big.dtype == jnp.float32, y_big.dtype
    assert bool(jnp.all(y_big == expected_big))

    # (2) Tiny input: takes the small-tensor bypass (no Pallas launch) but
    #     must produce identical results.
    x_small = jax.random.normal(jax.random.PRNGKey(0), (2, 16, 16),
                                dtype=jnp.bfloat16)
    y_small = jax.block_until_ready(encoder_decoder_forward(x_small))
    expected_small = jnp.expand_dims(x_small, axis=1).astype(jnp.float32)
    assert y_small.shape == (2, 1, 16, 16), y_small.shape
    assert y_small.dtype == jnp.float32, y_small.dtype
    assert bool(jnp.all(y_small == expected_small))

    print("KERNEL_OK")
</pallas_src>

<mosaic_0001>
module attributes {stable_mosaic.version = 11 : i64} {
  func.func @_cast_kernel(%arg0: i32, %arg1: memref<16x32768xbf16, #tpu.memory_space<vmem>>, %arg2: memref<16x32768xf32, #tpu.memory_space<vmem>>) attributes {dimension_semantics = [#tpu.dimension_semantics<parallel>], iteration_bounds = array<i64: 2>, scalar_prefetch = 0 : i64, scratch_operands = 0 : i64, tpu.core_type = #tpu.core_type<tc>, window_params = [{transform_indices = @transform_0, window_bounds = array<i64: 16, 32768>}, {transform_indices = @transform_1, window_bounds = array<i64: 16, 32768>}]} {
    %c0 = arith.constant 0 : index
    %c0_0 = arith.constant 0 : index
    %0 = vector.load %arg1[%c0, %c0_0] : memref<16x32768xbf16, #tpu.memory_space<vmem>>, vector<16x32768xbf16>
    %1 = arith.extf %0 : vector<16x32768xbf16> to vector<16x32768xf32>
    %c0_1 = arith.constant 0 : index
    %c0_2 = arith.constant 0 : index
    %2 = vector.load %arg2[%c0_1, %c0_2] : memref<16x32768xf32, #tpu.memory_space<vmem>>, vector<16x32768xf32>
    tpu.vector_store %arg2[%c0_1, %c0_2], %1 {strides = array<i32>} : memref<16x32768xf32, #tpu.memory_space<vmem>>, vector<16x32768xf32>,
    return
  }
  func.func @transform_0(%arg0: i32) -> (i32, i32) {
    %c0_i32 = arith.constant 0 : i32
    %c0_i32_0 = arith.constant 0 : i32
    return %arg0, %c0_i32 : i32, i32
  }
  func.func @transform_1(%arg0: i32) -> (i32, i32) {
    %c0_i32 = arith.constant 0 : i32
    %c0_i32_0 = arith.constant 0 : i32
    return %arg0, %c0_i32 : i32, i32
  }
}

</mosaic_0001>

<bundles_post_ra>
// kernel: tpu_custom_call.1
= control target key start
LH: loop header
LB: loop body
LE: loop exit
PB: predicated region body
PF: predicated region fallthrough
CT: control target
= control target key end

     0   :  { %6 = vsyncpa [#allocation3], 0  ;;  %s2614_s0 = inlined_call_operand.hbm [shape: bf16[32,32768], index: 0, kind: input, shape index: {}]   ;;  %s2615_s1 = inlined_call_operand.hbm [shape: f32[32,32768], index: 1, kind: output, shape index: {}]  }
   0x1   :  { %8 = vsyncpa [#allocation3 + $0x1], 0 }
   0x2   :  { %9 = vsyncpa [#allocation4], 0 }
   0x3   :  { %11 = vsyncpa [#allocation4 + $0x1], 0  ;;  %s1686_s6 = smov 0   ;;  %s1688_s7 = smov 0  }
   0x4   :  { %s1690_s8 = smov 0   ;;  %s1692_s9 = smov 0  }
   0x5 LB: > { %s1707_s10 = sadd.s32 4294967295, %s1668_s9   ;;  %s1506_s11 = sadd.s32 4294967294, %s1668_s9   ;;  %s1668_s9 = sphi %s1692_s9, %s2630_s9   ;;  %s1664_s8 = sphi %s1690_s8, %s2629_s8   ;;  %s1660_s7 = sphi %s1688_s7, %s2628_s7   ;;  %s1656_s6 = sphi %s1686_s6, %s2627_s6  }
   0x6   : > { %s1711_s12 = sadd.s32 1, %s1668_s9   ;;  %s24_s13 = sadd.s32 1, %s1664_s8 }
   0x7   : > { %s21_s14 = ssub.s32 %s1668_s9, %s1711_s12  ;;  %p31_p0 = scmp.ne.s32.totalorder %s1664_s8, %s1660_s7 }
   0x8   : > { %p22_p1 = scmp.eq.s32.totalorder %s21_s14, 0  ;;  %p32_p2 = scmp.eq.s32.totalorder %s1668_s9, 0 }
   0x9   : > { %p37_p3 = scmp.ne.s32.totalorder %s1660_s7, %s1656_s6  ;;  %p38_p4 = scmp.eq.s32.totalorder %s1707_s10, 0 }
   0xa   : > { %s1723_s15 = scalar_select %p22_p1, %s1664_s8, %s24_s13  }
   0xb   : > { %p1725_p5 = por %p32_p2, %p31_p0  ;;  %p1729_p6 = por %p38_p4, %p37_p3 }
   0xc   : > { %p61_p7 = scmp.eq.s32.totalorder %s1707_s10, 1  ;;  %p67_p8 = scmp.eq.s32.totalorder %s1506_s11, 1 }
   0xd   : > { %s2619_s17 = scalar_select %p1729_p6, 1, 0 }
   0xe   : > { %p1538_p10 = scmp.lt.s32.totalorder %s1668_s9, 2  ;;  %p1736_p11 = por %p61_p7, %p31_p0 }
   0xf   : > { %p1740_p12 = por %p67_p8, %p37_p3  ;;  %s87_s20 = sand.u32 1, %s1664_s8  }
  0x10   : > { %s2620_s18 = scalar_select %p1736_p11, 1, 0 }
  0x11   : > { %s2621_s19 = scalar_select %p1740_p12, 1, 0 }
  0x12   : > { %s1523_s21 = sshll.u32 %s1668_s9, 15  ;;  %s1509_s22 = sshll.u32 %s87_s20, 11 }
  0x13   : > { %s1749_s25 = scalar_lea.hbm %s2614_s0, %s1523_s21  ;;  %s91_s26 = scalar_lea.vmem [#allocation2], %s1509_s22 }
  0x14   : > { %s99_s27 = sshll.u32 %s91_s26, 4  ;;  %p1753_p13 = pnand %p1538_p10, %p1725_p5  ;;  %s1757_s27 = int_to_ptr.vmem [resolvable:$true] %s99_s27 }
  0x15   : > { %s1759_s29 = scalar_lea.sflag [#allocation3], %s87_s20  ;;  %s1576_s30 = scalar_lea.hbm %s1749_s25, 32768 }
  0x16   : > { %p1577_p0 = scmp.ne.s32.totalorder %s1749_s25, %s1576_s30  ;;  %p1578_p1 = pneg %p1753_p13 }
  0x17   : > { %s1581_s4 = scalar_lea.hbm %s2614_s0, 65536  ;;  %p1582_p4 = scmp.lt.s32.totalorder %s1749_s25, %s2614_s0 }
  0x18   : > { %p1579_p2 = pnand %p1578_p1, %p1577_p0  ;;  %p1583_p5 = scmp.lt.s32.totalorder %s1581_s4, %s1576_s30 }
  0x1a   : > { %p1580_p3 = pneg %p1579_p2  ;;  %p1584_p7 = por %p1583_p5, %p1582_p4 }
  0x1c   : > { %p1585_p8 = pnand %p1584_p7, %p1580_p3 }
  0x1e   : > { %1588 = shalt.err (!%p1585_p8)
}
  0x1f   : > { %s1589_s13 = scalar_lea.vmem %s1757_s27, 32768  ;;  %s1670_s14 = smov [#allocation2]  }
  0x20   : > { %p1590_p10 = scmp.ne.s32.totalorder %s1757_s27, %s1589_s13  ;;  %s1594_s16 = sshll.u32 %s1670_s14, 4  ;;  %s1595_s16 = int_to_ptr.vmem [resolvable:$false] %s1594_s16 }
  0x21   : > { %s1596_s20 = scalar_lea.vmem %s1595_s16, 65536  ;;  %p1597_p2 = scmp.lt.s32.totalorder %s1757_s27, %s1595_s16 }
  0x22   : > { %p1592_p9 = pnand %p1590_p10, %p1578_p1  ;;  %p1598_p12 = scmp.lt.s32.totalorder %s1596_s20, %s1589_s13 }
  0x24   : > { %p1593_p0 = pneg %p1592_p9  ;;  %p1599_p11 = por %p1598_p12, %p1597_p2 }
  0x26   : > { %p1600_p6 = pnand %p1599_p11, %p1593_p0 }
  0x28   : > { %1603 = shalt.err (!%p1600_p6)
}
  0x29   : > { %s1671_s21 = smov 16384   ;;  %s1672_s22 = smov 1024  }
  0x2a   : > { %1533 = dma.hbm_to_vmem [thread:$0]  (!%p1753_p13), %s1749_s25, 32768, %s1757_s27, %s1759_s29, %s1671_s21, %s1671_s21, %s1672_s22  }
  0x2b   : > { %p1513_p9 = scmp.ge.s32.totalorder %s1668_s9, 1  ;;  %p107_p1 = scmp.lt.s32.totalorder %s1668_s9, 3 }
  0x2d   : > { %p108_p3 = pnand %p1513_p9, %p107_p1 }
  0x2e   : > { %s1783_s23 = sand.u32 (!%p108_p3), 1, %s1660_s7   ;;  %p2623_p6 = scmp.ne.s32.totalorder (!%p108_p3), %s2619_s17, 0 }
  0x2f   : > { %111 = sbr.rel (%p108_p3) target bundleno = 325 (0x145), region = 24  ;;  %s1514_s24 = sshll.u32 (!%p108_p3), %s1783_s23, 11 }
  0x30   : > { %s114_s26 = scalar_lea.sflag (!%p108_p3), [#allocation3], %s1783_s23  ;;  %s1787_s30 = scalar_lea.vmem (!%p108_p3), [#allocation2], %s1514_s24 }
  0x34   : > { %1647 = dma.done.wait (%p2623_p6), %s114_s26, 32768  }
  0x35   : > { %1649 = vsyncadd (%p2623_p6), %s114_s26, 4294934528  ;;  %s1515_s25 = sshll.u32 %s1783_s23, 12  ;;  %v138_v0 = vld [vmem:[%s1787_s30] sm:$0xff]  ;;  %v139_v1 = vld [vmem:[%s1787_s30 + $0x8] sm:$0xff]  ;;  %s1525_s27 = sshll.u32 %s1707_s10, 16 }
  0x36   : > { %v140_v2 = vld [vmem:[%s1787_s30 + $0x10] sm:$0xff]  ;;  %v394_v3 = vunpack.c.l.bf16 %v138_v0  ;;  %v395_v4 = vunpack.c.h.bf16 %v138_v0  ;;  %v396_v5 = vunpack.c.l.bf16 %v139_v1  ;;  %v397_v6 = vunpack.c.h.bf16 %v139_v1  ;;  %v141_v7 = vld [vmem:[%s1787_s30 + $0x18] sm:$0xff]  ;;  %v142_v8 = vld [vmem:[%s1787_s30 + $0x20] sm:$0xff]  ;;  %s1803_s17 = scalar_lea.vmem [#allocation5], %s1515_s25  ;;  %s2557_s2 = scalar_lea.hbm %s2615_s1, %s1525_s27 }
  0x37   : > { %v143_v9 = vld [vmem:[%s1787_s30 + $0x28] sm:$0xff]  ;;  %v398_v10 = vunpack.c.l.bf16 %v140_v2  ;;  %v399_v11 = vunpack.c.h.bf16 %v140_v2  ;;  %v400_v12 = vunpack.c.l.bf16 %v141_v7  ;;  %v401_v13 = vunpack.c.h.bf16 %v141_v7  ;;  %v144_v14 = vld [vmem:[%s1787_s30 + $0x30] sm:$0xff]  ;;  %v145_v15 = vld [vmem:[%s1787_s30 + $0x38] sm:$0xff]  ;;  %s1433_s28 = sshll.u32 %s1803_s17, 4  ;;  %s1419_s3 = scalar_lea.sflag [#allocation4], %s1783_s23  ;;  %s2559_s28 = int_to_ptr.vmem [resolvable:$true] %s1433_s28 }
  0x38   : > { %v146_v16 = vld [vmem:[%s1787_s30 + $0x40] sm:$0xff]  ;;  %906 = vst [vmem:[%s1803_s17] sm:$0xff] %v394_v3  ;;  %907 = vst [vmem:[%s1803_s17 + $0x8] sm:$0xff] %v395_v4  ;;  %v402_v17 = vunpack.c.l.bf16 %v142_v8  ;;  %v403_v18 = vunpack.c.h.bf16 %v142_v8  ;;  %v404_v19 = vunpack.c.l.bf16 %v143_v9  ;;  %v405_v20 = vunpack.c.h.bf16 %v143_v9  ;;  %v147_v21 = vld [vmem:[%s1787_s30 + $0x48] sm:$0xff]  ;;  %s1604_s4 = scalar_lea.vmem %s2559_s28, 65536  ;;  %p2624_p12 = scmp.ne.s32.totalorder %s2620_s18, 0 }
  0x39   : > { %908 = vst [vmem:[%s1803_s17 + $0x10] sm:$0xff] %v396_v5  ;;  %909 = vst [vmem:[%s1803_s17 + $0x18] sm:$0xff] %v397_v6  ;;  %v148_v22 = vld [vmem:[%s1787_s30 + $0x50] sm:$0xff]  ;;  %v149_v23 = vld [vmem:[%s1787_s30 + $0x58] sm:$0xff]  ;;  %v406_v24 = vunpack.c.l.bf16 %v144_v14  ;;  %v407_v25 = vunpack.c.h.bf16 %v144_v14  ;;  %v408_v26 = vunpack.c.l.bf16 %v145_v15  ;;  %v409_v27 = vunpack.c.h.bf16 %v145_v15  ;;  %p1605_p11 = scmp.ne.s32.totalorder %s2559_s28, %s1604_s4  ;;  %s1673_s5 = smov [#allocation5]  }
  0x3a   : > { %910 = vst [vmem:[%s1803_s17 + $0x20] sm:$0xff] %v398_v10  ;;  %911 = vst [vmem:[%s1803_s17 + $0x28] sm:$0xff] %v399_v11  ;;  %v150_v28 = vld [vmem:[%s1787_s30 + $0x60] sm:$0xff]  ;;  %v151_v29 = vld [vmem:[%s1787_s30 + $0x68] sm:$0xff]  ;;  %v410_v30 = vunpack.c.l.bf16 %v146_v16  ;;  %v411_v31 = vunpack.c.h.bf16 %v146_v16  ;;  %v412_v32 = vunpack.c.l.bf16 %v147_v21  ;;  %v413_v33 = vunpack.c.h.bf16 %v147_v21  ;;  %s1608_s11 = sshll.u32 %s1673_s5, 4  ;;  %s1609_s11 = int_to_ptr.vmem [resolvable:$false] %s1608_s11 }
  0x3b   : > { %912 = vst [vmem:[%s1803_s17 + $0x30] sm:$0xff] %v400_v12  ;;  %913 = vst [vmem:[%s1803_s17 + $0x38] sm:$0xff] %v401_v13  ;;  %v152_v34 = vld [vmem:[%s1787_s30 + $0x70] sm:$0xff]  ;;  %v153_v35 = vld [vmem:[%s1787_s30 + $0x78] sm:$0xff]  ;;  %v414_v36 = vunpack.c.l.bf16 %v148_v22  ;;  %v415_v37 = vunpack.c.h.bf16 %v148_v22  ;;  %v416_v38 = vunpack.c.l.bf16 %v149_v23  ;;  %v417_v39 = vunpack.c.h.bf16 %v149_v23  ;;  %p1606_p13 = pnand %p1605_p11, %p2624_p12  ;;  %s1610_s13 = scalar_lea.vmem %s1609_s11, 131072 }
  0x3c   : > { %914 = vst [vmem:[%s1803_s17 + $0x40] sm:$0xff] %v402_v17  ;;  %915 = vst [vmem:[%s1803_s17 + $0x48] sm:$0xff] %v403_v18  ;;  %v154_v40 = vld [vmem:[%s1787_s30 + $0x80] sm:$0xff]  ;;  %v155_v41 = vld [vmem:[%s1787_s30 + $0x88] sm:$0xff]  ;;  %v418_v42 = vunpack.c.l.bf16 %v150_v28  ;;  %v419_v43 = vunpack.c.h.bf16 %v150_v28  ;;  %v420_v44 = vunpack.c.l.bf16 %v151_v29  ;;  %v421_v45 = vunpack.c.h.bf16 %v151_v29  ;;  %p1611_p5 = scmp.lt.s32.totalorder %s2559_s28, %s1609_s11  ;;  %p1612_p7 = scmp.lt.s32.totalorder %s1610_s13, %s1604_s4 }
  0x3d   : > { %916 = vst [vmem:[%s1803_s17 + $0x50] sm:$0xff] %v404_v19  ;;  %917 = vst [vmem:[%s1803_s17 + $0x58] sm:$0xff] %v405_v20  ;;  %v156_v46 = vld [vmem:[%s1787_s30 + $0x90] sm:$0xff]  ;;  %v157_v47 = vld [vmem:[%s1787_s30 + $0x98] sm:$0xff]  ;;  %v422_v48 = vunpack.c.l.bf16 %v152_v34  ;;  %v423_v49 = vunpack.c.h.bf16 %v152_v34  ;;  %v424_v50 = vunpack.c.l.bf16 %v153_v35  ;;  %v425_v51 = vunpack.c.h.bf16 %v153_v35  ;;  %p1607_p4 = pneg %p1606_p13 }
  0x3e   : > { %918 = vst [vmem:[%s1803_s17 + $0x60] sm:$0xff] %v406_v24  ;;  %919 = vst [vmem:[%s1803_s17 + $0x68] sm:$0xff] %v407_v25  ;;  %v158_v52 = vld [vmem:[%s1787_s30 + $0xa0] sm:$0xff]  ;;  %v159_v53 = vld [vmem:[%s1787_s30 + $0xa8] sm:$0xff]  ;;  %v426_v54 = vunpack.c.l.bf16 %v154_v40  ;;  %v427_v55 = vunpack.c.h.bf16 %v154_v40  ;;  %v428_v56 = vunpack.c.l.bf16 %v155_v41  ;;  %v429_v57 = vunpack.c.h.bf16 %v155_v41  ;;  %p1613_p8 = por %p1612_p7, %p1611_p5 }
  0x3f   : > { %920 = vst [vmem:[%s1803_s17 + $0x70] sm:$0xff] %v408_v26  ;;  %921 = vst [vmem:[%s1803_s17 + $0x78] sm:$0xff] %v409_v27  ;;  %v160_v58 = vld [vmem:[%s1787_s30 + $0xb0] sm:$0xff]  ;;  %v161_v59 = vld [vmem:[%s1787_s30 + $0xb8] sm:$0xff]  ;;  %v430_v60 = vunpack.c.l.bf16 %v156_v46  ;;  %v431_v61 = vunpack.c.h.bf16 %v156_v46  ;;  %v432_v62 = vunpack.c.l.bf16 %v157_v47  ;;  %v433_v63 = vunpack.c.h.bf16 %v157_v47 }
  0x40   : > { %922 = vst [vmem:[%s1803_s17 + $0x80] sm:$0xff] %v410_v30  ;;  %923 = vst [vmem:[%s1803_s17 + $0x88] sm:$0xff] %v411_v31  ;;  %v162_v0 = vld [vmem:[%s1787_s30 + $0xc0] sm:$0xff]  ;;  %v163_v1 = vld [vmem:[%s1787_s30 + $0xc8] sm:$0xff]  ;;  %v434_v2 = vunpack.c.l.bf16 %v158_v52  ;;  %v435_v3 = vunpack.c.h.bf16 %v158_v52  ;;  %v436_v4 = vunpack.c.l.bf16 %v159_v53  ;;  %v437_v5 = vunpack.c.h.bf16 %v159_v53  ;;  %p1614_p10 = pnand %p1613_p8, %p1607_p4 }
  0x41   : > { %924 = vst [vmem:[%s1803_s17 + $0x90] sm:$0xff] %v412_v32  ;;  %925 = vst [vmem:[%s1803_s17 + $0x98] sm:$0xff] %v413_v33  ;;  %v164_v6 = vld [vmem:[%s1787_s30 + $0xd0] sm:$0xff]  ;;  %v165_v7 = vld [vmem:[%s1787_s30 + $0xd8] sm:$0xff]  ;;  %v438_v8 = vunpack.c.l.bf16 %v160_v58  ;;  %v439_v9 = vunpack.c.h.bf16 %v160_v58  ;;  %v440_v10 = vunpack.c.l.bf16 %v161_v59  ;;  %v441_v11 = vunpack.c.h.bf16 %v161_v59 }
  0x42   : > { %926 = vst [vmem:[%s1803_s17 + $0xa0] sm:$0xff] %v414_v36  ;;  %927 = vst [vmem:[%s1803_s17 + $0xa8] sm:$0xff] %v415_v37  ;;  %v166_v12 = vld [vmem:[%s1787_s30 + $0xe0] sm:$0xff]  ;;  %v167_v13 = vld [vmem:[%s1787_s30 + $0xe8] sm:$0xff]  ;;  %v442_v14 = vunpack.c.l.bf16 %v162_v0  ;;  %v443_v15 = vunpack.c.h.bf16 %v162_v0  ;;  %v444_v16 = vunpack.c.l.bf16 %v163_v1  ;;  %v445_v17 = vunpack.c.h.bf16 %v163_v1 }
  0x43   : > { %928 = vst [vmem:[%s1803_s17 + $0xb0] sm:$0xff] %v416_v38  ;;  %929 = vst [vmem:[%s1803_s17 + $0xb8] sm:$0xff] %v417_v39  ;;  %v168_v18 = vld [vmem:[%s1787_s30 + $0xf0] sm:$0xff]  ;;  %v169_v19 = vld [vmem:[%s1787_s30 + $0xf8] sm:$0xff]  ;;  %v446_v20 = vunpack.c.l.bf16 %v164_v6  ;;  %v447_v21 = vunpack.c.h.bf16 %v164_v6  ;;  %v448_v22 = vunpack.c.l.bf16 %v165_v7  ;;  %v449_v23 = vunpack.c.h.bf16 %v165_v7 }
  0x44   : > { %930 = vst [vmem:[%s1803_s17 + $0xc0] sm:$0xff] %v418_v42  ;;  %931 = vst [vmem:[%s1803_s17 + $0xc8] sm:$0xff] %v419_v43  ;;  %v170_v24 = vld [vmem:[%s1787_s30 + $0x100] sm:$0xff]  ;;  %v171_v25 = vld [vmem:[%s1787_s30 + $0x108] sm:$0xff]  ;;  %v450_v26 = vunpack.c.l.bf16 %v166_v12  ;;  %v451_v27 = vunpack.c.h.bf16 %v166_v12  ;;  %v452_v28 = vunpack.c.l.bf16 %v167_v13  ;;  %v453_v29 = vunpack.c.h.bf16 %v167_v13 }
  0x45   : > { %932 = vst [vmem:[%s1803_s17 + $0xd0] sm:$0xff] %v420_v44  ;;  %933 = vst [vmem:[%s1803_s17 + $0xd8] sm:$0xff] %v421_v45  ;;  %v172_v30 = vld [vmem:[%s1787_s30 + $0x110] sm:$0xff]  ;;  %v173_v31 = vld [vmem:[%s1787_s30 + $0x118] sm:$0xff]  ;;  %v454_v32 = vunpack.c.l.bf16 %v168_v18  ;;  %v455_v33 = vunpack.c.h.bf16 %v168_v18  ;;  %v456_v34 = vunpack.c.l.bf16 %v169_v19  ;;  %v457_v35 = vunpack.c.h.bf16 %v169_v19 }
  0x46   : > { %934 = vst [vmem:[%s1803_s17 + $0xe0] sm:$0xff] %v422_v48  ;;  %935 = vst [vmem:[%s1803_s17 + $0xe8] sm:$0xff] %v423_v49  ;;  %v174_v36 = vld [vmem:[%s1787_s30 + $0x120] sm:$0xff]  ;;  %v175_v37 = vld [vmem:[%s1787_s30 + $0x128] sm:$0xff]  ;;  %v458_v38 = vunpack.c.l.bf16 %v170_v24  ;;  %v459_v39 = vunpack.c.h.bf16 %v170_v24  ;;  %v460_v40 = vunpack.c.l.bf16 %v171_v25  ;;  %v461_v41 = vunpack.c.h.bf16 %v171_v25 }
  0x47   : > { %936 = vst [vmem:[%s1803_s17 + $0xf0] sm:$0xff] %v424_v50  ;;  %937 = vst [vmem:[%s1803_s17 + $0xf8] sm:$0xff] %v425_v51  ;;  %v176_v42 = vld [vmem:[%s1787_s30 + $0x130] sm:$0xff]  ;;  %v177_v43 = vld [vmem:[%s1787_s30 + $0x138] sm:$0xff]  ;;  %v462_v44 = vunpack.c.l.bf16 %v172_v30  ;;  %v463_v45 = vunpack.c.h.bf16 %v172_v30  ;;  %v464_v46 = vunpack.c.l.bf16 %v173_v31  ;;  %v465_v47 = vunpack.c.h.bf16 %v173_v31 }
  0x48   : > { %938 = vst [vmem:[%s1803_s17 + $0x100] sm:$0xff] %v426_v54  ;;  %939 = vst [vmem:[%s1803_s17 + $0x108] sm:$0xff] %v427_v55  ;;  %v178_v48 = vld [vmem:[%s1787_s30 + $0x140] sm:$0xff]  ;;  %v179_v49 = vld [vmem:[%s1787_s30 + $0x148] sm:$0xff]  ;;  %v466_v50 = vunpack.c.l.bf16 %v174_v36  ;;  %v467_v51 = vunpack.c.h.bf16 %v174_v36  ;;  %v468_v52 = vunpack.c.l.bf16 %v175_v37  ;;  %v469_v53 = vunpack.c.h.bf16 %v175_v37 }
  0x49   : > { %940 = vst [vmem:[%s1803_s17 + $0x110] sm:$0xff] %v428_v56  ;;  %941 = vst [vmem:[%s1803_s17 + $0x118] sm:$0xff] %v429_v57  ;;  %v180_v54 = vld [vmem:[%s1787_s30 + $0x150] sm:$0xff]  ;;  %v181_v55 = vld [vmem:[%s1787_s30 + $0x158] sm:$0xff]  ;;  %v470_v56 = vunpack.c.l.bf16 %v176_v42  ;;  %v471_v57 = vunpack.c.h.bf16 %v176_v42  ;;  %v472_v58 = vunpack.c.l.bf16 %v177_v43  ;;  %v473_v59 = vunpack.c.h.bf16 %v177_v43 }
  0x4a   : > { %942 = vst [vmem:[%s1803_s17 + $0x120] sm:$0xff] %v430_v60  ;;  %943 = vst [vmem:[%s1803_s17 + $0x128] sm:$0xff] %v431_v61  ;;  %v182_v60 = vld [vmem:[%s1787_s30 + $0x160] sm:$0xff]  ;;  %v183_v61 = vld [vmem:[%s1787_s30 + $0x168] sm:$0xff]  ;;  %v476_v0 = vunpack.c.l.bf16 %v179_v49  ;;  %v477_v1 = vunpack.c.h.bf16 %v179_v49  ;;  %v480_v6 = vunpack.c.l.bf16 %v181_v55  ;;  %v481_v7 = vunpack.c.h.bf16 %v181_v55 }
  0x4b   : > { %944 = vst [vmem:[%s1803_s17 + $0x130] sm:$0xff] %v432_v62  ;;  %945 = vst [vmem:[%s1803_s17 + $0x138] sm:$0xff] %v433_v63  ;;  %v474_v62 = vunpack.c.l.bf16 %v178_v48  ;;  %v475_v63 = vunpack.c.h.bf16 %v178_v48  ;;  %v484_v12 = vunpack.c.l.bf16 %v183_v61  ;;  %v485_v13 = vunpack.c.h.bf16 %v183_v61 }
  0x4c   : > { %946 = vst [vmem:[%s1803_s17 + $0x140] sm:$0xff] %v434_v2  ;;  %947 = vst [vmem:[%s1803_s17 + $0x148] sm:$0xff] %v435_v3  ;;  %v184_v2 = vld [vmem:[%s1787_s30 + $0x170] sm:$0xff]  ;;  %v185_v3 = vld [vmem:[%s1787_s30 + $0x178] sm:$0xff] }
  0x4d   : > { %948 = vst [vmem:[%s1803_s17 + $0x150] sm:$0xff] %v436_v4  ;;  %949 = vst [vmem:[%s1803_s17 + $0x158] sm:$0xff] %v437_v5  ;;  %v478_v4 = vunpack.c.l.bf16 %v180_v54  ;;  %v479_v5 = vunpack.c.h.bf16 %v180_v54  ;;  %v488_v18 = vunpack.c.l.bf16 %v185_v3  ;;  %v489_v19 = vunpack.c.h.bf16 %v185_v3 }
  0x4e   : > { %950 = vst [vmem:[%s1803_s17 + $0x160] sm:$0xff] %v438_v8  ;;  %951 = vst [vmem:[%s1803_s17 + $0x168] sm:$0xff] %v439_v9  ;;  %v186_v8 = vld [vmem:[%s1787_s30 + $0x180] sm:$0xff]  ;;  %v187_v9 = vld [vmem:[%s1787_s30 + $0x188] sm:$0xff] }
  0x4f   : > { %952 = vst [vmem:[%s1803_s17 + $0x170] sm:$0xff] %v440_v10  ;;  %953 = vst [vmem:[%s1803_s17 + $0x178] sm:$0xff] %v441_v11  ;;  %v482_v10 = vunpack.c.l.bf16 %v182_v60  ;;  %v483_v11 = vunpack.c.h.bf16 %v182_v60  ;;  %v492_v24 = vunpack.c.l.bf16 %v187_v9  ;;  %v493_v25 = vunpack.c.h.bf16 %v187_v9 }
  0x50   : > { %954 = vst [vmem:[%s1803_s17 + $0x180] sm:$0xff] %v442_v14  ;;  %955 = vst [vmem:[%s1803_s17 + $0x188] sm:$0xff] %v443_v15  ;;  %v188_v14 = vld [vmem:[%s1787_s30 + $0x190] sm:$0xff]  ;;  %v189_v15 = vld [vmem:[%s1787_s30 + $0x198] sm:$0xff] }
  0x51   : > { %956 = vst [vmem:[%s1803_s17 + $0x190] sm:$0xff] %v444_v16  ;;  %957 = vst [vmem:[%s1803_s17 + $0x198] sm:$0xff] %v445_v17  ;;  %v486_v16 = vunpack.c.l.bf16 %v184_v2  ;;  %v487_v17 = vunpack.c.h.bf16 %v184_v2  ;;  %v496_v30 = vunpack.c.l.bf16 %v189_v15  ;;  %v497_v31 = vunpack.c.h.bf16 %v189_v15 }
  0x52   : > { %958 = vst [vmem:[%s1803_s17 + $0x1a0] sm:$0xff] %v446_v20  ;;  %959 = vst [vmem:[%s1803_s17 + $0x1a8] sm:$0xff] %v447_v21  ;;  %v190_v20 = vld [vmem:[%s1787_s30 + $0x1a0] sm:$0xff]  ;;  %v191_v21 = vld [vmem:[%s1787_s30 + $0x1a8] sm:$0xff] }
  0x53   : > { %960 = vst [vmem:[%s1803_s17 + $0x1b0] sm:$0xff] %v448_v22  ;;  %961 = vst [vmem:[%s1803_s17 + $0x1b8] sm:$0xff] %v449_v23  ;;  %v490_v22 = vunpack.c.l.bf16 %v186_v8  ;;  %v491_v23 = vunpack.c.h.bf16 %v186_v8  ;;  %v500_v36 = vunpack.c.l.bf16 %v191_v21  ;;  %v501_v37 = vunpack.c.h.bf16 %v191_v21 }
  0x54   : > { %962 = vst [vmem:[%s1803_s17 + $0x1c0] sm:$0xff] %v450_v26  ;;  %963 = vst [vmem:[%s1803_s17 + $0x1c8] sm:$0xff] %v451_v27  ;;  %v192_v26 = vld [vmem:[%s1787_s30 + $0x1b0] sm:$0xff]  ;;  %v193_v27 = vld [vmem:[%s1787_s30 + $0x1b8] sm:$0xff] }
  0x55   : > { %964 = vst [vmem:[%s1803_s17 + $0x1d0] sm:$0xff] %v452_v28  ;;  %965 = vst [vmem:[%s1803_s17 + $0x1d8] sm:$0xff] %v453_v29  ;;  %v494_v28 = vunpack.c.l.bf16 %v188_v14  ;;  %v495_v29 = vunpack.c.h.bf16 %v188_v14  ;;  %v504_v42 = vunpack.c.l.bf16 %v193_v27  ;;  %v505_v43 = vunpack.c.h.bf16 %v193_v27 }
  0x56   : > { %966 = vst [vmem:[%s1803_s17 + $0x1e0] sm:$0xff] %v454_v32  ;;  %967 = vst [vmem:[%s1803_s17 + $0x1e8] sm:$0xff] %v455_v33  ;;  %v194_v32 = vld [vmem:[%s1787_s30 + $0x1c0] sm:$0xff]  ;;  %v195_v33 = vld [vmem:[%s1787_s30 + $0x1c8] sm:$0xff] }
  0x57   : > { %968 = vst [vmem:[%s1803_s17 + $0x1f0] sm:$0xff] %v456_v34  ;;  %969 = vst [vmem:[%s1803_s17 + $0x1f8] sm:$0xff] %v457_v35  ;;  %v498_v34 = vunpack.c.l.bf16 %v190_v20  ;;  %v499_v35 = vunpack.c.h.bf16 %v190_v20  ;;  %v508_v48 = vunpack.c.l.bf16 %v195_v33  ;;  %v509_v49 = vunpack.c.h.bf16 %v195_v33 }
  0x58   : > { %970 = vst [vmem:[%s1803_s17 + $0x200] sm:$0xff] %v458_v38  ;;  %971 = vst [vmem:[%s1803_s17 + $0x208] sm:$0xff] %v459_v39  ;;  %v196_v38 = vld [vmem:[%s1787_s30 + $0x1d0] sm:$0xff]  ;;  %v197_v39 = vld [vmem:[%s1787_s30 + $0x1d8] sm:$0xff] }
  0x59   : > { %972 = vst [vmem:[%s1803_s17 + $0x210] sm:$0xff] %v460_v40  ;;  %973 = vst [vmem:[%s1803_s17 + $0x218] sm:$0xff] %v461_v41  ;;  %v502_v40 = vunpack.c.l.bf16 %v192_v26  ;;  %v503_v41 = vunpack.c.h.bf16 %v192_v26  ;;  %v512_v54 = vunpack.c.l.bf16 %v197_v39  ;;  %v513_v55 = vunpack.c.h.bf16 %v197_v39 }
  0x5a   : > { %974 = vst [vmem:[%s1803_s17 + $0x220] sm:$0xff] %v462_v44  ;;  %975 = vst [vmem:[%s1803_s17 + $0x228] sm:$0xff] %v463_v45  ;;  %v198_v44 = vld [vmem:[%s1787_s30 + $0x1e0] sm:$0xff]  ;;  %v199_v45 = vld [vmem:[%s1787_s30 + $0x1e8] sm:$0xff] }
  0x5b   : > { %976 = vst [vmem:[%s1803_s17 + $0x230] sm:$0xff] %v464_v46  ;;  %977 = vst [vmem:[%s1803_s17 + $0x238] sm:$0xff] %v465_v47  ;;  %v506_v46 = vunpack.c.l.bf16 %v194_v32  ;;  %v507_v47 = vunpack.c.h.bf16 %v194_v32  ;;  %v516_v60 = vunpack.c.l.bf16 %v199_v45  ;;  %v517_v61 = vunpack.c.h.bf16 %v199_v45 }
  0x5c   : > { %978 = vst [vmem:[%s1803_s17 + $0x240] sm:$0xff] %v466_v50  ;;  %979 = vst [vmem:[%s1803_s17 + $0x248] sm:$0xff] %v467_v51  ;;  %v200_v50 = vld [vmem:[%s1787_s30 + $0x1f0] sm:$0xff]  ;;  %v201_v51 = vld [vmem:[%s1787_s30 + $0x1f8] sm:$0xff] }
  0x5d   : > { %980 = vst [vmem:[%s1803_s17 + $0x250] sm:$0xff] %v468_v52  ;;  %981 = vst [vmem:[%s1803_s17 + $0x258] sm:$0xff] %v469_v53  ;;  %v510_v52 = vunpack.c.l.bf16 %v196_v38  ;;  %v511_v53 = vunpack.c.h.bf16 %v196_v38  ;;  %v520_v2 = vunpack.c.l.bf16 %v201_v51  ;;  %v521_v3 = vunpack.c.h.bf16 %v201_v51 }
  0x5e   : > { %982 = vst [vmem:[%s1803_s17 + $0x260] sm:$0xff] %v470_v56  ;;  %983 = vst [vmem:[%s1803_s17 + $0x268] sm:$0xff] %v471_v57  ;;  %v202_v56 = vld [vmem:[%s1787_s30 + $0x200] sm:$0xff]  ;;  %v203_v57 = vld [vmem:[%s1787_s30 + $0x208] sm:$0xff] }
  0x5f   : > { %984 = vst [vmem:[%s1803_s17 + $0x270] sm:$0xff] %v472_v58  ;;  %985 = vst [vmem:[%s1803_s17 + $0x278] sm:$0xff] %v473_v59  ;;  %v514_v58 = vunpack.c.l.bf16 %v198_v44  ;;  %v515_v59 = vunpack.c.h.bf16 %v198_v44  ;;  %v524_v8 = vunpack.c.l.bf16 %v203_v57  ;;  %v525_v9 = vunpack.c.h.bf16 %v203_v57 }
  0x60   : > { %986 = vst [vmem:[%s1803_s17 + $0x280] sm:$0xff] %v474_v62  ;;  %987 = vst [vmem:[%s1803_s17 + $0x288] sm:$0xff] %v475_v63  ;;  %v204_v62 = vld [vmem:[%s1787_s30 + $0x210] sm:$0xff]  ;;  %v205_v63 = vld [vmem:[%s1787_s30 + $0x218] sm:$0xff] }
  0x61   : > { %988 = vst [vmem:[%s1803_s17 + $0x290] sm:$0xff] %v476_v0  ;;  %989 = vst [vmem:[%s1803_s17 + $0x298] sm:$0xff] %v477_v1  ;;  %v518_v0 = vunpack.c.l.bf16 %v200_v50  ;;  %v519_v1 = vunpack.c.h.bf16 %v200_v50  ;;  %v528_v14 = vunpack.c.l.bf16 %v205_v63  ;;  %v529_v15 = vunpack.c.h.bf16 %v205_v63 }
  0x62   : > { %990 = vst [vmem:[%s1803_s17 + $0x2a0] sm:$0xff] %v478_v4  ;;  %991 = vst [vmem:[%s1803_s17 + $0x2a8] sm:$0xff] %v479_v5  ;;  %v206_v4 = vld [vmem:[%s1787_s30 + $0x220] sm:$0xff]  ;;  %v207_v5 = vld [vmem:[%s1787_s30 + $0x228] sm:$0xff] }
  0x63   : > { %992 = vst [vmem:[%s1803_s17 + $0x2b0] sm:$0xff] %v480_v6  ;;  %993 = vst [vmem:[%s1803_s17 + $0x2b8] sm:$0xff] %v481_v7  ;;  %v522_v6 = vunpack.c.l.bf16 %v202_v56  ;;  %v523_v7 = vunpack.c.h.bf16 %v202_v56  ;;  %v532_v20 = vunpack.c.l.bf16 %v207_v5  ;;  %v533_v21 = vunpack.c.h.bf16 %v207_v5 }
  0x64   : > { %994 = vst [vmem:[%s1803_s17 + $0x2c0] sm:$0xff] %v482_v10  ;;  %995 = vst [vmem:[%s1803_s17 + $0x2c8] sm:$0xff] %v483_v11  ;;  %v208_v10 = vld [vmem:[%s1787_s30 + $0x230] sm:$0xff]  ;;  %v209_v11 = vld [vmem:[%s1787_s30 + $0x238] sm:$0xff] }
  0x65   : > { %996 = vst [vmem:[%s1803_s17 + $0x2d0] sm:$0xff] %v484_v12  ;;  %997 = vst [vmem:[%s1803_s17 + $0x2d8] sm:$0xff] %v485_v13  ;;  %v526_v12 = vunpack.c.l.bf16 %v204_v62  ;;  %v527_v13 = vunpack.c.h.bf16 %v204_v62  ;;  %v536_v26 = vunpack.c.l.bf16 %v209_v11  ;;  %v537_v27 = vunpack.c.h.bf16 %v209_v11 }
  0x66   : > { %998 = vst [vmem:[%s1803_s17 + $0x2e0] sm:$0xff] %v486_v16  ;;  %999 = vst [vmem:[%s1803_s17 + $0x2e8] sm:$0xff] %v487_v17  ;;  %v210_v16 = vld [vmem:[%s1787_s30 + $0x240] sm:$0xff]  ;;  %v211_v17 = vld [vmem:[%s1787_s30 + $0x248] sm:$0xff] }
  0x67   : > { %1000 = vst [vmem:[%s1803_s17 + $0x2f0] sm:$0xff] %v488_v18  ;;  %1001 = vst [vmem:[%s1803_s17 + $0x2f8] sm:$0xff] %v489_v19  ;;  %v530_v18 = vunpack.c.l.bf16 %v206_v4  ;;  %v531_v19 = vunpack.c.h.bf16 %v206_v4  ;;  %v540_v32 = vunpack.c.l.bf16 %v211_v17  ;;  %v541_v33 = vunpack.c.h.bf16 %v211_v17 }
  0x68   : > { %1002 = vst [vmem:[%s1803_s17 + $0x300] sm:$0xff] %v490_v22  ;;  %1003 = vst [vmem:[%s1803_s17 + $0x308] sm:$0xff] %v491_v23  ;;  %v212_v22 = vld [vmem:[%s1787_s30 + $0x250] sm:$0xff]  ;;  %v213_v23 = vld [vmem:[%s1787_s30 + $0x258] sm:$0xff] }
  0x69   : > { %1004 = vst [vmem:[%s1803_s17 + $0x310] sm:$0xff] %v492_v24  ;;  %1005 = vst [vmem:[%s1803_s17 + $0x318] sm:$0xff] %v493_v25  ;;  %v534_v24 = vunpack.c.l.bf16 %v208_v10  ;;  %v535_v25 = vunpack.c.h.bf16 %v208_v10  ;;  %v544_v38 = vunpack.c.l.bf16 %v213_v23  ;;  %v545_v39 = vunpack.c.h.bf16 %v213_v23 }
  0x6a   : > { %1006 = vst [vmem:[%s1803_s17 + $0x320] sm:$0xff] %v494_v28  ;;  %1007 = vst [vmem:[%s1803_s17 + $0x328] sm:$0xff] %v495_v29  ;;  %v214_v28 = vld [vmem:[%s1787_s30 + $0x260] sm:$0xff]  ;;  %v215_v29 = vld [vmem:[%s1787_s30 + $0x268] sm:$0xff] }
  0x6b   : > { %1008 = vst [vmem:[%s1803_s17 + $0x330] sm:$0xff] %v496_v30  ;;  %1009 = vst [vmem:[%s1803_s17 + $0x338] sm:$0xff] %v497_v31  ;;  %v538_v30 = vunpack.c.l.bf16 %v210_v16  ;;  %v539_v31 = vunpack.c.h.bf16 %v210_v16  ;;  %v548_v44 = vunpack.c.l.bf16 %v215_v29  ;;  %v549_v45 = vunpack.c.h.bf16 %v215_v29 }
  0x6c   : > { %1010 = vst [vmem:[%s1803_s17 + $0x340] sm:$0xff] %v498_v34  ;;  %1011 = vst [vmem:[%s1803_s17 + $0x348] sm:$0xff] %v499_v35  ;;  %v216_v34 = vld [vmem:[%s1787_s30 + $0x270] sm:$0xff]  ;;  %v217_v35 = vld [vmem:[%s1787_s30 + $0x278] sm:$0xff] }
  0x6d   : > { %1012 = vst [vmem:[%s1803_s17 + $0x350] sm:$0xff] %v500_v36  ;;  %1013 = vst [vmem:[%s1803_s17 + $0x358] sm:$0xff] %v501_v37  ;;  %v542_v36 = vunpack.c.l.bf16 %v212_v22  ;;  %v543_v37 = vunpack.c.h.bf16 %v212_v22  ;;  %v552_v50 = vunpack.c.l.bf16 %v217_v35  ;;  %v553_v51 = vunpack.c.h.bf16 %v217_v35 }
  0x6e   : > { %1014 = vst [vmem:[%s1803_s17 + $0x360] sm:$0xff] %v502_v40  ;;  %1015 = vst [vmem:[%s1803_s17 + $0x368] sm:$0xff] %v503_v41  ;;  %v218_v40 = vld [vmem:[%s1787_s30 + $0x280] sm:$0xff]  ;;  %v219_v41 = vld [vmem:[%s1787_s30 + $0x288] sm:$0xff] }
  0x6f   : > { %1016 = vst [vmem:[%s1803_s17 + $0x370] sm:$0xff] %v504_v42  ;;  %1017 = vst [vmem:[%s1803_s17 + $0x378] sm:$0xff] %v505_v43  ;;  %v546_v42 = vunpack.c.l.bf16 %v214_v28  ;;  %v547_v43 = vunpack.c.h.bf16 %v214_v28  ;;  %v556_v56 = vunpack.c.l.bf16 %v219_v41  ;;  %v557_v57 = vunpack.c.h.bf16 %v219_v41 }
  0x70   : > { %1018 = vst [vmem:[%s1803_s17 + $0x380] sm:$0xff] %v506_v46  ;;  %1019 = vst [vmem:[%s1803_s17 + $0x388] sm:$0xff] %v507_v47  ;;  %v220_v46 = vld [vmem:[%s1787_s30 + $0x290] sm:$0xff]  ;;  %v221_v47 = vld [vmem:[%s1787_s30 + $0x298] sm:$0xff] }
  0x71   : > { %1020 = vst [vmem:[%s1803_s17 + $0x390] sm:$0xff] %v508_v48  ;;  %1021 = vst [vmem:[%s1803_s17 + $0x398] sm:$0xff] %v509_v49  ;;  %v550_v48 = vunpack.c.l.bf16 %v216_v34  ;;  %v551_v49 = vunpack.c.h.bf16 %v216_v34  ;;  %v560_v62 = vunpack.c.l.bf16 %v221_v47  ;;  %v561_v63 = vunpack.c.h.bf16 %v221_v47 }
  0x72   : > { %1022 = vst [vmem:[%s1803_s17 + $0x3a0] sm:$0xff] %v510_v52  ;;  %1023 = vst [vmem:[%s1803_s17 + $0x3a8] sm:$0xff] %v511_v53  ;;  %v222_v52 = vld [vmem:[%s1787_s30 + $0x2a0] sm:$0xff]  ;;  %v223_v53 = vld [vmem:[%s1787_s30 + $0x2a8] sm:$0xff] }
  0x73   : > { %1024 = vst [vmem:[%s1803_s17 + $0x3b0] sm:$0xff] %v512_v54  ;;  %1025 = vst [vmem:[%s1803_s17 + $0x3b8] sm:$0xff] %v513_v55  ;;  %v554_v54 = vunpack.c.l.bf16 %v218_v40  ;;  %v555_v55 = vunpack.c.h.bf16 %v218_v40  ;;  %v564_v4 = vunpack.c.l.bf16 %v223_v53  ;;  %v565_v5 = vunpack.c.h.bf16 %v223_v53 }
  0x74   : > { %1026 = vst [vmem:[%s1803_s17 + $0x3c0] sm:$0xff] %v514_v58  ;;  %1027 = vst [vmem:[%s1803_s17 + $0x3c8] sm:$0xff] %v515_v59  ;;  %v224_v58 = vld [vmem:[%s1787_s30 + $0x2b0] sm:$0xff]  ;;  %v225_v59 = vld [vmem:[%s1787_s30 + $0x2b8] sm:$0xff] }
  0x75   : > { %1028 = vst [vmem:[%s1803_s17 + $0x3d0] sm:$0xff] %v516_v60  ;;  %1029 = vst [vmem:[%s1803_s17 + $0x3d8] sm:$0xff] %v517_v61  ;;  %v558_v60 = vunpack.c.l.bf16 %v220_v46  ;;  %v559_v61 = vunpack.c.h.bf16 %v220_v46  ;;  %v568_v10 = vunpack.c.l.bf16 %v225_v59  ;;  %v569_v11 = vunpack.c.h.bf16 %v225_v59 }
  0x76   : > { %1030 = vst [vmem:[%s1803_s17 + $0x3e0] sm:$0xff] %v518_v0  ;;  %1031 = vst [vmem:[%s1803_s17 + $0x3e8] sm:$0xff] %v519_v1  ;;  %v226_v0 = vld [vmem:[%s1787_s30 + $0x2c0] sm:$0xff]  ;;  %v227_v1 = vld [vmem:[%s1787_s30 + $0x2c8] sm:$0xff] }
  0x77   : > { %1032 = vst [vmem:[%s1803_s17 + $0x3f0] sm:$0xff] %v520_v2  ;;  %1033 = vst [vmem:[%s1803_s17 + $0x3f8] sm:$0xff] %v521_v3  ;;  %v562_v2 = vunpack.c.l.bf16 %v222_v52  ;;  %v563_v3 = vunpack.c.h.bf16 %v222_v52  ;;  %v572_v16 = vunpack.c.l.bf16 %v227_v1  ;;  %v573_v17 = vunpack.c.h.bf16 %v227_v1 }
  0x78   : > { %1034 = vst [vmem:[%s1803_s17 + $0x400] sm:$0xff] %v522_v6  ;;  %1035 = vst [vmem:[%s1803_s17 + $0x408] sm:$0xff] %v523_v7  ;;  %v228_v6 = vld [vmem:[%s1787_s30 + $0x2d0] sm:$0xff]  ;;  %v229_v7 = vld [vmem:[%s1787_s30 + $0x2d8] sm:$0xff] }
  0x79   : > { %1036 = vst [vmem:[%s1803_s17 + $0x410] sm:$0xff] %v524_v8  ;;  %1037 = vst [vmem:[%s1803_s17 + $0x418] sm:$0xff] %v525_v9  ;;  %v566_v8 = vunpack.c.l.bf16 %v224_v58  ;;  %v567_v9 = vunpack.c.h.bf16 %v224_v58  ;;  %v576_v22 = vunpack.c.l.bf16 %v229_v7  ;;  %v577_v23 = vunpack.c.h.bf16 %v229_v7 }
  0x7a   : > { %1038 = vst [vmem:[%s1803_s17 + $0x420] sm:$0xff] %v526_v12  ;;  %1039 = vst [vmem:[%s1803_s17 + $0x428] sm:$0xff] %v527_v13  ;;  %v230_v12 = vld [vmem:[%s1787_s30 + $0x2e0] sm:$0xff]  ;;  %v231_v13 = vld [vmem:[%s1787_s30 + $0x2e8] sm:$0xff] }
  0x7b   : > { %1040 = vst [vmem:[%s1803_s17 + $0x430] sm:$0xff] %v528_v14  ;;  %1041 = vst [vmem:[%s1803_s17 + $0x438] sm:$0xff] %v529_v15  ;;  %v570_v14 = vunpack.c.l.bf16 %v226_v0  ;;  %v571_v15 = vunpack.c.h.bf16 %v226_v0  ;;  %v580_v28 = vunpack.c.l.bf16 %v231_v13  ;;  %v581_v29 = vunpack.c.h.bf16 %v231_v13 }
  0x7c   : > { %1042 = vst [vmem:[%s1803_s17 + $0x440] sm:$0xff] %v530_v18  ;;  %1043 = vst [vmem:[%s1803_s17 + $0x448] sm:$0xff] %v531_v19  ;;  %v232_v18 = vld [vmem:[%s1787_s30 + $0x2f0] sm:$0xff]  ;;  %v233_v19 = vld [vmem:[%s1787_s30 + $0x2f8] sm:$0xff] }
  0x7d   : > { %1044 = vst [vmem:[%s1803_s17 + $0x450] sm:$0xff] %v532_v20  ;;  %1045 = vst [vmem:[%s1803_s17 + $0x458] sm:$0xff] %v533_v21  ;;  %v574_v20 = vunpack.c.l.bf16 %v228_v6  ;;  %v575_v21 = vunpack.c.h.bf16 %v228_v6  ;;  %v584_v34 = vunpack.c.l.bf16 %v233_v19  ;;  %v585_v35 = vunpack.c.h.bf16 %v233_v19 }
  0x7e   : > { %1046 = vst [vmem:[%s1803_s17 + $0x460] sm:$0xff] %v534_v24  ;;  %1047 = vst [vmem:[%s1803_s17 + $0x468] sm:$0xff] %v535_v25  ;;  %v234_v24 = vld [vmem:[%s1787_s30 + $0x300] sm:$0xff]  ;;  %v235_v25 = vld [vmem:[%s1787_s30 + $0x308] sm:$0xff] }
  0x7f   : > { %1048 = vst [vmem:[%s1803_s17 + $0x470] sm:$0xff] %v536_v26  ;;  %1049 = vst [vmem:[%s1803_s17 + $0x478] sm:$0xff] %v537_v27  ;;  %v578_v26 = vunpack.c.l.bf16 %v230_v12  ;;  %v579_v27 = vunpack.c.h.bf16 %v230_v12  ;;  %v588_v40 = vunpack.c.l.bf16 %v235_v25  ;;  %v589_v41 = vunpack.c.h.bf16 %v235_v25 }
  0x80   : > { %1050 = vst [vmem:[%s1803_s17 + $0x480] sm:$0xff] %v538_v30  ;;  %1051 = vst [vmem:[%s1803_s17 + $0x488] sm:$0xff] %v539_v31  ;;  %v236_v30 = vld [vmem:[%s1787_s30 + $0x310] sm:$0xff]  ;;  %v237_v31 = vld [vmem:[%s1787_s30 + $0x318] sm:$0xff] }
  0x81   : > { %1052 = vst [vmem:[%s1803_s17 + $0x490] sm:$0xff] %v540_v32  ;;  %1053 = vst [vmem:[%s1803_s17 + $0x498] sm:$0xff] %v541_v33  ;;  %v582_v32 = vunpack.c.l.bf16 %v232_v18  ;;  %v583_v33 = vunpack.c.h.bf16 %v232_v18  ;;  %v592_v46 = vunpack.c.l.bf16 %v237_v31  ;;  %v593_v47 = vunpack.c.h.bf16 %v237_v31 }
  0x82   : > { %1054 = vst [vmem:[%s1803_s17 + $0x4a0] sm:$0xff] %v542_v36  ;;  %1055 = vst [vmem:[%s1803_s17 + $0x4a8] sm:$0xff] %v543_v37  ;;  %v238_v36 = vld [vmem:[%s1787_s30 + $0x320] sm:$0xff]  ;;  %v239_v37 = vld [vmem:[%s1787_s30 + $0x328] sm:$0xff] }
  0x83   : > { %1056 = vst [vmem:[%s1803_s17 + $0x4b0] sm:$0xff] %v544_v38  ;;  %1057 = vst [vmem:[%s1803_s17 + $0x4b8] sm:$0xff] %v545_v39  ;;  %v586_v38 = vunpack.c.l.bf16 %v234_v24  ;;  %v587_v39 = vunpack.c.h.bf16 %v234_v24  ;;  %v596_v52 = vunpack.c.l.bf16 %v239_v37  ;;  %v597_v53 = vunpack.c.h.bf16 %v239_v37 }
  0x84   : > { %1058 = vst [vmem:[%s1803_s17 + $0x4c0] sm:$0xff] %v546_v42  ;;  %1059 = vst [vmem:[%s1803_s17 + $0x4c8] sm:$0xff] %v547_v43  ;;  %v240_v42 = vld [vmem:[%s1787_s30 + $0x330] sm:$0xff]  ;;  %v241_v43 = vld [vmem:[%s1787_s30 + $0x338] sm:$0xff] }
  0x85   : > { %1060 = vst [vmem:[%s1803_s17 + $0x4d0] sm:$0xff] %v548_v44  ;;  %1061 = vst [vmem:[%s1803_s17 + $0x4d8] sm:$0xff] %v549_v45  ;;  %v590_v44 = vunpack.c.l.bf16 %v236_v30  ;;  %v591_v45 = vunpack.c.h.bf16 %v236_v30  ;;  %v600_v58 = vunpack.c.l.bf16 %v241_v43  ;;  %v601_v59 = vunpack.c.h.bf16 %v241_v43 }
  0x86   : > { %1062 = vst [vmem:[%s1803_s17 + $0x4e0] sm:$0xff] %v550_v48  ;;  %1063 = vst [vmem:[%s1803_s17 + $0x4e8] sm:$0xff] %v551_v49  ;;  %v242_v48 = vld [vmem:[%s1787_s30 + $0x340] sm:$0xff]  ;;  %v243_v49 = vld [vmem:[%s1787_s30 + $0x348] sm:$0xff] }
  0x87   : > { %1064 = vst [vmem:[%s1803_s17 + $0x4f0] sm:$0xff] %v552_v50  ;;  %1065 = vst [vmem:[%s1803_s17 + $0x4f8] sm:$0xff] %v553_v51  ;;  %v594_v50 = vunpack.c.l.bf16 %v238_v36  ;;  %v595_v51 = vunpack.c.h.bf16 %v238_v36  ;;  %v604_v0 = vunpack.c.l.bf16 %v243_v49  ;;  %v605_v1 = vunpack.c.h.bf16 %v243_v49 }
  0x88   : > { %1066 = vst [vmem:[%s1803_s17 + $0x500] sm:$0xff] %v554_v54  ;;  %1067 = vst [vmem:[%s1803_s17 + $0x508] sm:$0xff] %v555_v55  ;;  %v244_v54 = vld [vmem:[%s1787_s30 + $0x350] sm:$0xff]  ;;  %v245_v55 = vld [vmem:[%s1787_s30 + $0x358] sm:$0xff] }
  0x89   : > { %1068 = vst [vmem:[%s1803_s17 + $0x510] sm:$0xff] %v556_v56  ;;  %1069 = vst [vmem:[%s1803_s17 + $0x518] sm:$0xff] %v557_v57  ;;  %v598_v56 = vunpack.c.l.bf16 %v240_v42  ;;  %v599_v57 = vunpack.c.h.bf16 %v240_v42  ;;  %v608_v6 = vunpack.c.l.bf16 %v245_v55  ;;  %v609_v7 = vunpack.c.h.bf16 %v245_v55 }
  0x8a   : > { %1070 = vst [vmem:[%s1803_s17 + $0x520] sm:$0xff] %v558_v60  ;;  %1071 = vst [vmem:[%s1803_s17 + $0x528] sm:$0xff] %v559_v61  ;;  %v246_v60 = vld [vmem:[%s1787_s30 + $0x360] sm:$0xff]  ;;  %v247_v61 = vld [vmem:[%s1787_s30 + $0x368] sm:$0xff] }
  0x8b   : > { %1072 = vst [vmem:[%s1803_s17 + $0x530] sm:$0xff] %v560_v62  ;;  %1073 = vst [vmem:[%s1803_s17 + $0x538] sm:$0xff] %v561_v63  ;;  %v602_v62 = vunpack.c.l.bf16 %v242_v48  ;;  %v603_v63 = vunpack.c.h.bf16 %v242_v48  ;;  %v612_v12 = vunpack.c.l.bf16 %v247_v61  ;;  %v613_v13 = vunpack.c.h.bf16 %v247_v61 }
  0x8c   : > { %1074 = vst [vmem:[%s1803_s17 + $0x540] sm:$0xff] %v562_v2  ;;  %1075 = vst [vmem:[%s1803_s17 + $0x548] sm:$0xff] %v563_v3  ;;  %v248_v2 = vld [vmem:[%s1787_s30 + $0x370] sm:$0xff]  ;;  %v249_v3 = vld [vmem:[%s1787_s30 + $0x378] sm:$0xff] }
  0x8d   : > { %1076 = vst [vmem:[%s1803_s17 + $0x550] sm:$0xff] %v564_v4  ;;  %1077 = vst [vmem:[%s1803_s17 + $0x558] sm:$0xff] %v565_v5  ;;  %v606_v4 = vunpack.c.l.bf16 %v244_v54  ;;  %v607_v5 = vunpack.c.h.bf16 %v244_v54  ;;  %v616_v18 = vunpack.c.l.bf16 %v249_v3  ;;  %v617_v19 = vunpack.c.h.bf16 %v249_v3 }
  0x8e   : > { %1078 = vst [vmem:[%s1803_s17 + $0x560] sm:$0xff] %v566_v8  ;;  %1079 = vst [vmem:[%s1803_s17 + $0x568] sm:$0xff] %v567_v9  ;;  %v250_v8 = vld [vmem:[%s1787_s30 + $0x380] sm:$0xff]  ;;  %v251_v9 = vld [vmem:[%s1787_s30 + $0x388] sm:$0xff] }
  0x8f   : > { %1080 = vst [vmem:[%s1803_s17 + $0x570] sm:$0xff] %v568_v10  ;;  %1081 = vst [vmem:[%s1803_s17 + $0x578] sm:$0xff] %v569_v11  ;;  %v610_v10 = vunpack.c.l.bf16 %v246_v60  ;;  %v611_v11 = vunpack.c.h.bf16 %v246_v60  ;;  %v620_v24 = vunpack.c.l.bf16 %v251_v9  ;;  %v621_v25 = vunpack.c.h.bf16 %v251_v9 }
  0x90   : > { %1082 = vst [vmem:[%s1803_s17 + $0x580] sm:$0xff] %v570_v14  ;;  %1083 = vst [vmem:[%s1803_s17 + $0x588] sm:$0xff] %v571_v15  ;;  %v252_v14 = vld [vmem:[%s1787_s30 + $0x390] sm:$0xff]  ;;  %v253_v15 = vld [vmem:[%s1787_s30 + $0x398] sm:$0xff] }
  0x91   : > { %1084 = vst [vmem:[%s1803_s17 + $0x590] sm:$0xff] %v572_v16  ;;  %1085 = vst [vmem:[%s1803_s17 + $0x598] sm:$0xff] %v573_v17  ;;  %v614_v16 = vunpack.c.l.bf16 %v248_v2  ;;  %v615_v17 = vunpack.c.h.bf16 %v248_v2  ;;  %v624_v30 = vunpack.c.l.bf16 %v253_v15  ;;  %v625_v31 = vunpack.c.h.bf16 %v253_v15 }
  0x92   : > { %1086 = vst [vmem:[%s1803_s17 + $0x5a0] sm:$0xff] %v574_v20  ;;  %1087 = vst [vmem:[%s1803_s17 + $0x5a8] sm:$0xff] %v575_v21  ;;  %v254_v20 = vld [vmem:[%s1787_s30 + $0x3a0] sm:$0xff]  ;;  %v255_v21 = vld [vmem:[%s1787_s30 + $0x3a8] sm:$0xff] }
  0x93   : > { %1088 = vst [vmem:[%s1803_s17 + $0x5b0] sm:$0xff] %v576_v22  ;;  %1089 = vst [vmem:[%s1803_s17 + $0x5b8] sm:$0xff] %v577_v23  ;;  %v618_v22 = vunpack.c.l.bf16 %v250_v8  ;;  %v619_v23 = vunpack.c.h.bf16 %v250_v8  ;;  %v628_v36 = vunpack.c.l.bf16 %v255_v21  ;;  %v629_v37 = vunpack.c.h.bf16 %v255_v21 }
  0x94   : > { %1090 = vst [vmem:[%s1803_s17 + $0x5c0] sm:$0xff] %v578_v26  ;;  %1091 = vst [vmem:[%s1803_s17 + $0x5c8] sm:$0xff] %v579_v27  ;;  %v256_v26 = vld [vmem:[%s1787_s30 + $0x3b0] sm:$0xff]  ;;  %v257_v27 = vld [vmem:[%s1787_s30 + $0x3b8] sm:$0xff] }
  0x95   : > { %1092 = vst [vmem:[%s1803_s17 + $0x5d0] sm:$0xff] %v580_v28  ;;  %1093 = vst [vmem:[%s1803_s17 + $0x5d8] sm:$0xff] %v581_v29  ;;  %v622_v28 = vunpack.c.l.bf16 %v252_v14  ;;  %v623_v29 = vunpack.c.h.bf16 %v252_v14  ;;  %v632_v42 = vunpack.c.l.bf16 %v257_v27  ;;  %v633_v43 = vunpack.c.h.bf16 %v257_v27 }
  0x96   : > { %1094 = vst [vmem:[%s1803_s17 + $0x5e0] sm:$0xff] %v582_v32  ;;  %1095 = vst [vmem:[%s1803_s17 + $0x5e8] sm:$0xff] %v583_v33  ;;  %v258_v32 = vld [vmem:[%s1787_s30 + $0x3c0] sm:$0xff]  ;;  %v259_v33 = vld [vmem:[%s1787_s30 + $0x3c8] sm:$0xff] }
  0x97   : > { %1096 = vst [vmem:[%s1803_s17 + $0x5f0] sm:$0xff] %v584_v34  ;;  %1097 = vst [vmem:[%s1803_s17 + $0x5f8] sm:$0xff] %v585_v35  ;;  %v626_v34 = vunpack.c.l.bf16 %v254_v20  ;;  %v627_v35 = vunpack.c.h.bf16 %v254_v20  ;;  %v636_v48 = vunpack.c.l.bf16 %v259_v33  ;;  %v637_v49 = vunpack.c.h.bf16 %v259_v33 }
  0x98   : > { %1098 = vst [vmem:[%s1803_s17 + $0x600] sm:$0xff] %v586_v38  ;;  %1099 = vst [vmem:[%s1803_s17 + $0x608] sm:$0xff] %v587_v39  ;;  %v260_v38 = vld [vmem:[%s1787_s30 + $0x3d0] sm:$0xff]  ;;  %v261_v39 = vld [vmem:[%s1787_s30 + $0x3d8] sm:$0xff] }
  0x99   : > { %1100 = vst [vmem:[%s1803_s17 + $0x610] sm:$0xff] %v588_v40  ;;  %1101 = vst [vmem:[%s1803_s17 + $0x618] sm:$0xff] %v589_v41  ;;  %v630_v40 = vunpack.c.l.bf16 %v256_v26  ;;  %v631_v41 = vunpack.c.h.bf16 %v256_v26  ;;  %v640_v54 = vunpack.c.l.bf16 %v261_v39  ;;  %v641_v55 = vunpack.c.h.bf16 %v261_v39 }
  0x9a   : > { %1102 = vst [vmem:[%s1803_s17 + $0x620] sm:$0xff] %v590_v44  ;;  %1103 = vst [vmem:[%s1803_s17 + $0x628] sm:$0xff] %v591_v45  ;;  %v262_v44 = vld [vmem:[%s1787_s30 + $0x3e0] sm:$0xff]  ;;  %v263_v45 = vld [vmem:[%s1787_s30 + $0x3e8] sm:$0xff] }
  0x9b   : > { %1104 = vst [vmem:[%s1803_s17 + $0x630] sm:$0xff] %v592_v46  ;;  %1105 = vst [vmem:[%s1803_s17 + $0x638] sm:$0xff] %v593_v47  ;;  %v634_v46 = vunpack.c.l.bf16 %v258_v32  ;;  %v635_v47 = vunpack.c.h.bf16 %v258_v32  ;;  %v644_v60 = vunpack.c.l.bf16 %v263_v45  ;;  %v645_v61 = vunpack.c.h.bf16 %v263_v45 }
  0x9c   : > { %1106 = vst [vmem:[%s1803_s17 + $0x640] sm:$0xff] %v594_v50  ;;  %1107 = vst [vmem:[%s1803_s17 + $0x648] sm:$0xff] %v595_v51  ;;  %v264_v50 = vld [vmem:[%s1787_s30 + $0x3f0] sm:$0xff]  ;;  %v265_v51 = vld [vmem:[%s1787_s30 + $0x3f8] sm:$0xff] }
  0x9d   : > { %1108 = vst [vmem:[%s1803_s17 + $0x650] sm:$0xff] %v596_v52  ;;  %1109 = vst [vmem:[%s1803_s17 + $0x658] sm:$0xff] %v597_v53  ;;  %v638_v52 = vunpack.c.l.bf16 %v260_v38  ;;  %v639_v53 = vunpack.c.h.bf16 %v260_v38  ;;  %v648_v2 = vunpack.c.l.bf16 %v265_v51  ;;  %v649_v3 = vunpack.c.h.bf16 %v265_v51 }
  0x9e   : > { %1110 = vst [vmem:[%s1803_s17 + $0x660] sm:$0xff] %v598_v56  ;;  %1111 = vst [vmem:[%s1803_s17 + $0x668] sm:$0xff] %v599_v57  ;;  %v266_v56 = vld [vmem:[%s1787_s30 + $0x400] sm:$0xff]  ;;  %v267_v57 = vld [vmem:[%s1787_s30 + $0x408] sm:$0xff] }
  0x9f   : > { %1112 = vst [vmem:[%s1803_s17 + $0x670] sm:$0xff] %v600_v58  ;;  %1113 = vst [vmem:[%s1803_s17 + $0x678] sm:$0xff] %v601_v59  ;;  %v642_v58 = vunpack.c.l.bf16 %v262_v44  ;;  %v643_v59 = vunpack.c.h.bf16 %v262_v44  ;;  %v652_v8 = vunpack.c.l.bf16 %v267_v57  ;;  %v653_v9 = vunpack.c.h.bf16 %v267_v57 }
  0xa0   : > { %1114 = vst [vmem:[%s1803_s17 + $0x680] sm:$0xff] %v602_v62  ;;  %1115 = vst [vmem:[%s1803_s17 + $0x688] sm:$0xff] %v603_v63  ;;  %v268_v62 = vld [vmem:[%s1787_s30 + $0x410] sm:$0xff]  ;;  %v269_v63 = vld [vmem:[%s1787_s30 + $0x418] sm:$0xff] }
  0xa1   : > { %1116 = vst [vmem:[%s1803_s17 + $0x690] sm:$0xff] %v604_v0  ;;  %1117 = vst [vmem:[%s1803_s17 + $0x698] sm:$0xff] %v605_v1  ;;  %v646_v0 = vunpack.c.l.bf16 %v264_v50  ;;  %v647_v1 = vunpack.c.h.bf16 %v264_v50  ;;  %v656_v14 = vunpack.c.l.bf16 %v269_v63  ;;  %v657_v15 = vunpack.c.h.bf16 %v269_v63 }
  0xa2   : > { %1118 = vst [vmem:[%s1803_s17 + $0x6a0] sm:$0xff] %v606_v4  ;;  %1119 = vst [vmem:[%s1803_s17 + $0x6a8] sm:$0xff] %v607_v5  ;;  %v270_v4 = vld [vmem:[%s1787_s30 + $0x420] sm:$0xff]  ;;  %v271_v5 = vld [vmem:[%s1787_s30 + $0x428] sm:$0xff] }
  0xa3   : > { %1120 = vst [vmem:[%s1803_s17 + $0x6b0] sm:$0xff] %v608_v6  ;;  %1121 = vst [vmem:[%s1803_s17 + $0x6b8] sm:$0xff] %v609_v7  ;;  %v650_v6 = vunpack.c.l.bf16 %v266_v56  ;;  %v651_v7 = vunpack.c.h.bf16 %v266_v56  ;;  %v660_v20 = vunpack.c.l.bf16 %v271_v5  ;;  %v661_v21 = vunpack.c.h.bf16 %v271_v5 }
  0xa4   : > { %1122 = vst [vmem:[%s1803_s17 + $0x6c0] sm:$0xff] %v610_v10  ;;  %1123 = vst [vmem:[%s1803_s17 + $0x6c8] sm:$0xff] %v611_v11  ;;  %v272_v10 = vld [vmem:[%s1787_s30 + $0x430] sm:$0xff]  ;;  %v273_v11 = vld [vmem:[%s1787_s30 + $0x438] sm:$0xff] }
  0xa5   : > { %1124 = vst [vmem:[%s1803_s17 + $0x6d0] sm:$0xff] %v612_v12  ;;  %1125 = vst [vmem:[%s1803_s17 + $0x6d8] sm:$0xff] %v613_v13  ;;  %v654_v12 = vunpack.c.l.bf16 %v268_v62  ;;  %v655_v13 = vunpack.c.h.bf16 %v268_v62  ;;  %v664_v26 = vunpack.c.l.bf16 %v273_v11  ;;  %v665_v27 = vunpack.c.h.bf16 %v273_v11 }
  0xa6   : > { %1126 = vst [vmem:[%s1803_s17 + $0x6e0] sm:$0xff] %v614_v16  ;;  %1127 = vst [vmem:[%s1803_s17 + $0x6e8] sm:$0xff] %v615_v17  ;;  %v274_v16 = vld [vmem:[%s1787_s30 + $0x440] sm:$0xff]  ;;  %v275_v17 = vld [vmem:[%s1787_s30 + $0x448] sm:$0xff] }
  0xa7   : > { %1128 = vst [vmem:[%s1803_s17 + $0x6f0] sm:$0xff] %v616_v18  ;;  %1129 = vst [vmem:[%s1803_s17 + $0x6f8] sm:$0xff] %v617_v19  ;;  %v658_v18 = vunpack.c.l.bf16 %v270_v4  ;;  %v659_v19 = vunpack.c.h.bf16 %v270_v4  ;;  %v668_v32 = vunpack.c.l.bf16 %v275_v17  ;;  %v669_v33 = vunpack.c.h.bf16 %v275_v17 }
  0xa8   : > { %1130 = vst [vmem:[%s1803_s17 + $0x700] sm:$0xff] %v618_v22  ;;  %1131 = vst [vmem:[%s1803_s17 + $0x708] sm:$0xff] %v619_v23  ;;  %v276_v22 = vld [vmem:[%s1787_s30 + $0x450] sm:$0xff]  ;;  %v277_v23 = vld [vmem:[%s1787_s30 + $0x458] sm:$0xff] }
  0xa9   : > { %1132 = vst [vmem:[%s1803_s17 + $0x710] sm:$0xff] %v620_v24  ;;  %1133 = vst [vmem:[%s1803_s17 + $0x718] sm:$0xff] %v621_v25  ;;  %v662_v24 = vunpack.c.l.bf16 %v272_v10  ;;  %v663_v25 = vunpack.c.h.bf16 %v272_v10  ;;  %v672_v38 = vunpack.c.l.bf16 %v277_v23  ;;  %v673_v39 = vunpack.c.h.bf16 %v277_v23 }
  0xaa   : > { %1134 = vst [vmem:[%s1803_s17 + $0x720] sm:$0xff] %v622_v28  ;;  %1135 = vst [vmem:[%s1803_s17 + $0x728] sm:$0xff] %v623_v29  ;;  %v278_v28 = vld [vmem:[%s1787_s30 + $0x460] sm:$0xff]  ;;  %v279_v29 = vld [vmem:[%s1787_s30 + $0x468] sm:$0xff] }
  0xab   : > { %1136 = vst [vmem:[%s1803_s17 + $0x730] sm:$0xff] %v624_v30  ;;  %1137 = vst [vmem:[%s1803_s17 + $0x738] sm:$0xff] %v625_v31  ;;  %v666_v30 = vunpack.c.l.bf16 %v274_v16  ;;  %v667_v31 = vunpack.c.h.bf16 %v274_v16  ;;  %v676_v44 = vunpack.c.l.bf16 %v279_v29  ;;  %v677_v45 = vunpack.c.h.bf16 %v279_v29 }
  0xac   : > { %1138 = vst [vmem:[%s1803_s17 + $0x740] sm:$0xff] %v626_v34  ;;  %1139 = vst [vmem:[%s1803_s17 + $0x748] sm:$0xff] %v627_v35  ;;  %v280_v34 = vld [vmem:[%s1787_s30 + $0x470] sm:$0xff]  ;;  %v281_v35 = vld [vmem:[%s1787_s30 + $0x478] sm:$0xff] }
  0xad   : > { %1140 = vst [vmem:[%s1803_s17 + $0x750] sm:$0xff] %v628_v36  ;;  %1141 = vst [vmem:[%s1803_s17 + $0x758] sm:$0xff] %v629_v37  ;;  %v670_v36 = vunpack.c.l.bf16 %v276_v22  ;;  %v671_v37 = vunpack.c.h.bf16 %v276_v22  ;;  %v680_v50 = vunpack.c.l.bf16 %v281_v35  ;;  %v681_v51 = vunpack.c.h.bf16 %v281_v35 }
  0xae   : > { %1142 = vst [vmem:[%s1803_s17 + $0x760] sm:$0xff] %v630_v40  ;;  %1143 = vst [vmem:[%s1803_s17 + $0x768] sm:$0xff] %v631_v41  ;;  %v282_v40 = vld [vmem:[%s1787_s30 + $0x480] sm:$0xff]  ;;  %v283_v41 = vld [vmem:[%s1787_s30 + $0x488] sm:$0xff] }
  0xaf   : > { %1144 = vst [vmem:[%s1803_s17 + $0x770] sm:$0xff] %v632_v42  ;;  %1145 = vst [vmem:[%s1803_s17 + $0x778] sm:$0xff] %v633_v43  ;;  %v674_v42 = vunpack.c.l.bf16 %v278_v28  ;;  %v675_v43 = vunpack.c.h.bf16 %v278_v28  ;;  %v684_v56 = vunpack.c.l.bf16 %v283_v41  ;;  %v685_v57 = vunpack.c.h.bf16 %v283_v41 }
  0xb0   : > { %1146 = vst [vmem:[%s1803_s17 + $0x780] sm:$0xff] %v634_v46  ;;  %1147 = vst [vmem:[%s1803_s17 + $0x788] sm:$0xff] %v635_v47  ;;  %v284_v46 = vld [vmem:[%s1787_s30 + $0x490] sm:$0xff]  ;;  %v285_v47 = vld [vmem:[%s1787_s30 + $0x498] sm:$0xff] }
  0xb1   : > { %1148 = vst [vmem:[%s1803_s17 + $0x790] sm:$0xff] %v636_v48  ;;  %1149 = vst [vmem:[%s1803_s17 + $0x798] sm:$0xff] %v637_v49  ;;  %v678_v48 = vunpack.c.l.bf16 %v280_v34  ;;  %v679_v49 = vunpack.c.h.bf16 %v280_v34  ;;  %v688_v62 = vunpack.c.l.bf16 %v285_v47  ;;  %v689_v63 = vunpack.c.h.bf16 %v285_v47 }
  0xb2   : > { %1150 = vst [vmem:[%s1803_s17 + $0x7a0] sm:$0xff] %v638_v52  ;;  %1151 = vst [vmem:[%s1803_s17 + $0x7a8] sm:$0xff] %v639_v53  ;;  %v286_v52 = vld [vmem:[%s1787_s30 + $0x4a0] sm:$0xff]  ;;  %v287_v53 = vld [vmem:[%s1787_s30 + $0x4a8] sm:$0xff] }
  0xb3   : > { %1152 = vst [vmem:[%s1803_s17 + $0x7b0] sm:$0xff] %v640_v54  ;;  %1153 = vst [vmem:[%s1803_s17 + $0x7b8] sm:$0xff] %v641_v55  ;;  %v682_v54 = vunpack.c.l.bf16 %v282_v40  ;;  %v683_v55 = vunpack.c.h.bf16 %v282_v40  ;;  %v692_v4 = vunpack.c.l.bf16 %v287_v53  ;;  %v693_v5 = vunpack.c.h.bf16 %v287_v53 }
  0xb4   : > { %1154 = vst [vmem:[%s1803_s17 + $0x7c0] sm:$0xff] %v642_v58  ;;  %1155 = vst [vmem:[%s1803_s17 + $0x7c8] sm:$0xff] %v643_v59  ;;  %v288_v58 = vld [vmem:[%s1787_s30 + $0x4b0] sm:$0xff]  ;;  %v289_v59 = vld [vmem:[%s1787_s30 + $0x4b8] sm:$0xff] }
  0xb5   : > { %1156 = vst [vmem:[%s1803_s17 + $0x7d0] sm:$0xff] %v644_v60  ;;  %1157 = vst [vmem:[%s1803_s17 + $0x7d8] sm:$0xff] %v645_v61  ;;  %v686_v60 = vunpack.c.l.bf16 %v284_v46  ;;  %v687_v61 = vunpack.c.h.bf16 %v284_v46  ;;  %v696_v10 = vunpack.c.l.bf16 %v289_v59  ;;  %v697_v11 = vunpack.c.h.bf16 %v289_v59 }
  0xb6   : > { %1158 = vst [vmem:[%s1803_s17 + $0x7e0] sm:$0xff] %v646_v0  ;;  %1159 = vst [vmem:[%s1803_s17 + $0x7e8] sm:$0xff] %v647_v1  ;;  %v290_v0 = vld [vmem:[%s1787_s30 + $0x4c0] sm:$0xff]  ;;  %v291_v1 = vld [vmem:[%s1787_s30 + $0x4c8] sm:$0xff] }
  0xb7   : > { %1160 = vst [vmem:[%s1803_s17 + $0x7f0] sm:$0xff] %v648_v2  ;;  %1161 = vst [vmem:[%s1803_s17 + $0x7f8] sm:$0xff] %v649_v3  ;;  %v690_v2 = vunpack.c.l.bf16 %v286_v52  ;;  %v691_v3 = vunpack.c.h.bf16 %v286_v52  ;;  %v700_v16 = vunpack.c.l.bf16 %v291_v1  ;;  %v701_v17 = vunpack.c.h.bf16 %v291_v1 }
  0xb8   : > { %1162 = vst [vmem:[%s1803_s17 + $0x800] sm:$0xff] %v650_v6  ;;  %1163 = vst [vmem:[%s1803_s17 + $0x808] sm:$0xff] %v651_v7  ;;  %v292_v6 = vld [vmem:[%s1787_s30 + $0x4d0] sm:$0xff]  ;;  %v293_v7 = vld [vmem:[%s1787_s30 + $0x4d8] sm:$0xff] }
  0xb9   : > { %1164 = vst [vmem:[%s1803_s17 + $0x810] sm:$0xff] %v652_v8  ;;  %1165 = vst [vmem:[%s1803_s17 + $0x818] sm:$0xff] %v653_v9  ;;  %v694_v8 = vunpack.c.l.bf16 %v288_v58  ;;  %v695_v9 = vunpack.c.h.bf16 %v288_v58  ;;  %v704_v22 = vunpack.c.l.bf16 %v293_v7  ;;  %v705_v23 = vunpack.c.h.bf16 %v293_v7 }
  0xba   : > { %1166 = vst [vmem:[%s1803_s17 + $0x820] sm:$0xff] %v654_v12  ;;  %1167 = vst [vmem:[%s1803_s17 + $0x828] sm:$0xff] %v655_v13  ;;  %v294_v12 = vld [vmem:[%s1787_s30 + $0x4e0] sm:$0xff]  ;;  %v295_v13 = vld [vmem:[%s1787_s30 + $0x4e8] sm:$0xff] }
  0xbb   : > { %1168 = vst [vmem:[%s1803_s17 + $0x830] sm:$0xff] %v656_v14  ;;  %1169 = vst [vmem:[%s1803_s17 + $0x838] sm:$0xff] %v657_v15  ;;  %v698_v14 = vunpack.c.l.bf16 %v290_v0  ;;  %v699_v15 = vunpack.c.h.bf16 %v290_v0  ;;  %v708_v28 = vunpack.c.l.bf16 %v295_v13  ;;  %v709_v29 = vunpack.c.h.bf16 %v295_v13 }
  0xbc   : > { %1170 = vst [vmem:[%s1803_s17 + $0x840] sm:$0xff] %v658_v18  ;;  %1171 = vst [vmem:[%s1803_s17 + $0x848] sm:$0xff] %v659_v19  ;;  %v296_v18 = vld [vmem:[%s1787_s30 + $0x4f0] sm:$0xff]  ;;  %v297_v19 = vld [vmem:[%s1787_s30 + $0x4f8] sm:$0xff] }
  0xbd   : > { %1172 = vst [vmem:[%s1803_s17 + $0x850] sm:$0xff] %v660_v20  ;;  %1173 = vst [vmem:[%s1803_s17 + $0x858] sm:$0xff] %v661_v21  ;;  %v702_v20 = vunpack.c.l.bf16 %v292_v6  ;;  %v703_v21 = vunpack.c.h.bf16 %v292_v6  ;;  %v712_v34 = vunpack.c.l.bf16 %v297_v19  ;;  %v713_v35 = vunpack.c.h.bf16 %v297_v19 }
  0xbe   : > { %1174 = vst [vmem:[%s1803_s17 + $0x860] sm:$0xff] %v662_v24  ;;  %1175 = vst [vmem:[%s1803_s17 + $0x868] sm:$0xff] %v663_v25  ;;  %v298_v24 = vld [vmem:[%s1787_s30 + $0x500] sm:$0xff]  ;;  %v299_v25 = vld [vmem:[%s1787_s30 + $0x508] sm:$0xff] }
  0xbf   : > { %1176 = vst [vmem:[%s1803_s17 + $0x870] sm:$0xff] %v664_v26  ;;  %1177 = vst [vmem:[%s1803_s17 + $0x878] sm:$0xff] %v665_v27  ;;  %v706_v26 = vunpack.c.l.bf16 %v294_v12  ;;  %v707_v27 = vunpack.c.h.bf16 %v294_v12  ;;  %v716_v40 = vunpack.c.l.bf16 %v299_v25  ;;  %v717_v41 = vunpack.c.h.bf16 %v299_v25 }
  0xc0   : > { %1178 = vst [vmem:[%s1803_s17 + $0x880] sm:$0xff] %v666_v30  ;;  %1179 = vst [vmem:[%s1803_s17 + $0x888] sm:$0xff] %v667_v31  ;;  %v300_v30 = vld [vmem:[%s1787_s30 + $0x510] sm:$0xff]  ;;  %v301_v31 = vld [vmem:[%s1787_s30 + $0x518] sm:$0xff] }
  0xc1   : > { %1180 = vst [vmem:[%s1803_s17 + $0x890] sm:$0xff] %v668_v32  ;;  %1181 = vst [vmem:[%s1803_s17 + $0x898] sm:$0xff] %v669_v33  ;;  %v710_v32 = vunpack.c.l.bf16 %v296_v18  ;;  %v711_v33 = vunpack.c.h.bf16 %v296_v18  ;;  %v720_v46 = vunpack.c.l.bf16 %v301_v31  ;;  %v721_v47 = vunpack.c.h.bf16 %v301_v31 }
  0xc2   : > { %1182 = vst [vmem:[%s1803_s17 + $0x8a0] sm:$0xff] %v670_v36  ;;  %1183 = vst [vmem:[%s1803_s17 + $0x8a8] sm:$0xff] %v671_v37  ;;  %v302_v36 = vld [vmem:[%s1787_s30 + $0x520] sm:$0xff]  ;;  %v303_v37 = vld [vmem:[%s1787_s30 + $0x528] sm:$0xff] }
  0xc3   : > { %1184 = vst [vmem:[%s1803_s17 + $0x8b0] sm:$0xff] %v672_v38  ;;  %1185 = vst [vmem:[%s1803_s17 + $0x8b8] sm:$0xff] %v673_v39  ;;  %v714_v38 = vunpack.c.l.bf16 %v298_v24  ;;  %v715_v39 = vunpack.c.h.bf16 %v298_v24  ;;  %v724_v52 = vunpack.c.l.bf16 %v303_v37  ;;  %v725_v53 = vunpack.c.h.bf16 %v303_v37 }
  0xc4   : > { %1186 = vst [vmem:[%s1803_s17 + $0x8c0] sm:$0xff] %v674_v42  ;;  %1187 = vst [vmem:[%s1803_s17 + $0x8c8] sm:$0xff] %v675_v43  ;;  %v304_v42 = vld [vmem:[%s1787_s30 + $0x530] sm:$0xff]  ;;  %v305_v43 = vld [vmem:[%s1787_s30 + $0x538] sm:$0xff] }
  0xc5   : > { %1188 = vst [vmem:[%s1803_s17 + $0x8d0] sm:$0xff] %v676_v44  ;;  %1189 = vst [vmem:[%s1803_s17 + $0x8d8] sm:$0xff] %v677_v45  ;;  %v718_v44 = vunpack.c.l.bf16 %v300_v30  ;;  %v719_v45 = vunpack.c.h.bf16 %v300_v30  ;;  %v728_v58 = vunpack.c.l.bf16 %v305_v43  ;;  %v729_v59 = vunpack.c.h.bf16 %v305_v43 }
  0xc6   : > { %1190 = vst [vmem:[%s1803_s17 + $0x8e0] sm:$0xff] %v678_v48  ;;  %1191 = vst [vmem:[%s1803_s17 + $0x8e8] sm:$0xff] %v679_v49  ;;  %v306_v48 = vld [vmem:[%s1787_s30 + $0x540] sm:$0xff]  ;;  %v307_v49 = vld [vmem:[%s1787_s30 + $0x548] sm:$0xff] }
  0xc7   : > { %1192 = vst [vmem:[%s1803_s17 + $0x8f0] sm:$0xff] %v680_v50  ;;  %1193 = vst [vmem:[%s1803_s17 + $0x8f8] sm:$0xff] %v681_v51  ;;  %v722_v50 = vunpack.c.l.bf16 %v302_v36  ;;  %v723_v51 = vunpack.c.h.bf16 %v302_v36  ;;  %v732_v0 = vunpack.c.l.bf16 %v307_v49  ;;  %v733_v1 = vunpack.c.h.bf16 %v307_v49 }
  0xc8   : > { %1194 = vst [vmem:[%s1803_s17 + $0x900] sm:$0xff] %v682_v54  ;;  %1195 = vst [vmem:[%s1803_s17 + $0x908] sm:$0xff] %v683_v55  ;;  %v308_v54 = vld [vmem:[%s1787_s30 + $0x550] sm:$0xff]  ;;  %v309_v55 = vld [vmem:[%s1787_s30 + $0x558] sm:$0xff] }
  0xc9   : > { %1196 = vst [vmem:[%s1803_s17 + $0x910] sm:$0xff] %v684_v56  ;;  %1197 = vst [vmem:[%s1803_s17 + $0x918] sm:$0xff] %v685_v57  ;;  %v726_v56 = vunpack.c.l.bf16 %v304_v42  ;;  %v727_v57 = vunpack.c.h.bf16 %v304_v42  ;;  %v736_v6 = vunpack.c.l.bf16 %v309_v55  ;;  %v737_v7 = vunpack.c.h.bf16 %v309_v55 }
  0xca   : > { %1198 = vst [vmem:[%s1803_s17 + $0x920] sm:$0xff] %v686_v60  ;;  %1199 = vst [vmem:[%s1803_s17 + $0x928] sm:$0xff] %v687_v61  ;;  %v310_v60 = vld [vmem:[%s1787_s30 + $0x560] sm:$0xff]  ;;  %v311_v61 = vld [vmem:[%s1787_s30 + $0x568] sm:$0xff] }
  0xcb   : > { %1200 = vst [vmem:[%s1803_s17 + $0x930] sm:$0xff] %v688_v62  ;;  %1201 = vst [vmem:[%s1803_s17 + $0x938] sm:$0xff] %v689_v63  ;;  %v730_v62 = vunpack.c.l.bf16 %v306_v48  ;;  %v731_v63 = vunpack.c.h.bf16 %v306_v48  ;;  %v740_v12 = vunpack.c.l.bf16 %v311_v61  ;;  %v741_v13 = vunpack.c.h.bf16 %v311_v61 }
  0xcc   : > { %1202 = vst [vmem:[%s1803_s17 + $0x940] sm:$0xff] %v690_v2  ;;  %1203 = vst [vmem:[%s1803_s17 + $0x948] sm:$0xff] %v691_v3  ;;  %v312_v2 = vld [vmem:[%s1787_s30 + $0x570] sm:$0xff]  ;;  %v313_v3 = vld [vmem:[%s1787_s30 + $0x578] sm:$0xff] }
  0xcd   : > { %1204 = vst [vmem:[%s1803_s17 + $0x950] sm:$0xff] %v692_v4  ;;  %1205 = vst [vmem:[%s1803_s17 + $0x958] sm:$0xff] %v693_v5  ;;  %v734_v4 = vunpack.c.l.bf16 %v308_v54  ;;  %v735_v5 = vunpack.c.h.bf16 %v308_v54  ;;  %v744_v18 = vunpack.c.l.bf16 %v313_v3  ;;  %v745_v19 = vunpack.c.h.bf16 %v313_v3 }
  0xce   : > { %1206 = vst [vmem:[%s1803_s17 + $0x960] sm:$0xff] %v694_v8  ;;  %1207 = vst [vmem:[%s1803_s17 + $0x968] sm:$0xff] %v695_v9  ;;  %v314_v8 = vld [vmem:[%s1787_s30 + $0x580] sm:$0xff]  ;;  %v315_v9 = vld [vmem:[%s1787_s30 + $0x588] sm:$0xff] }
  0xcf   : > { %1208 = vst [vmem:[%s1803_s17 + $0x970] sm:$0xff] %v696_v10  ;;  %1209 = vst [vmem:[%s1803_s17 + $0x978] sm:$0xff] %v697_v11  ;;  %v738_v10 = vunpack.c.l.bf16 %v310_v60  ;;  %v739_v11 = vunpack.c.h.bf16 %v310_v60  ;;  %v748_v24 = vunpack.c.l.bf16 %v315_v9  ;;  %v749_v25 = vunpack.c.h.bf16 %v315_v9 }
  0xd0   : > { %1210 = vst [vmem:[%s1803_s17 + $0x980] sm:$0xff] %v698_v14  ;;  %1211 = vst [vmem:[%s1803_s17 + $0x988] sm:$0xff] %v699_v15  ;;  %v316_v14 = vld [vmem:[%s1787_s30 + $0x590] sm:$0xff]  ;;  %v317_v15 = vld [vmem:[%s1787_s30 + $0x598] sm:$0xff] }
  0xd1   : > { %1212 = vst [vmem:[%s1803_s17 + $0x990] sm:$0xff] %v700_v16  ;;  %1213 = vst [vmem:[%s1803_s17 + $0x998] sm:$0xff] %v701_v17  ;;  %v742_v16 = vunpack.c.l.bf16 %v312_v2  ;;  %v743_v17 = vunpack.c.h.bf16 %v312_v2  ;;  %v752_v30 = vunpack.c.l.bf16 %v317_v15  ;;  %v753_v31 = vunpack.c.h.bf16 %v317_v15 }
  0xd2   : > { %1214 = vst [vmem:[%s1803_s17 + $0x9a0] sm:$0xff] %v702_v20  ;;  %1215 = vst [vmem:[%s1803_s17 + $0x9a8] sm:$0xff] %v703_v21  ;;  %v318_v20 = vld [vmem:[%s1787_s30 + $0x5a0] sm:$0xff]  ;;  %v319_v21 = vld [vmem:[%s1787_s30 + $0x5a8] sm:$0xff] }
  0xd3   : > { %1216 = vst [vmem:[%s1803_s17 + $0x9b0] sm:$0xff] %v704_v22  ;;  %1217 = vst [vmem:[%s1803_s17 + $0x9b8] sm:$0xff] %v705_v23  ;;  %v746_v22 = vunpack.c.l.bf16 %v314_v8  ;;  %v747_v23 = vunpack.c.h.bf16 %v314_v8  ;;  %v756_v36 = vunpack.c.l.bf16 %v319_v21  ;;  %v757_v37 = vunpack.c.h.bf16 %v319_v21 }
  0xd4   : > { %1218 = vst [vmem:[%s1803_s17 + $0x9c0] sm:$0xff] %v706_v26  ;;  %1219 = vst [vmem:[%s1803_s17 + $0x9c8] sm:$0xff] %v707_v27  ;;  %v320_v26 = vld [vmem:[%s1787_s30 + $0x5b0] sm:$0xff]  ;;  %v321_v27 = vld [vmem:[%s1787_s30 + $0x5b8] sm:$0xff] }
  0xd5   : > { %1220 = vst [vmem:[%s1803_s17 + $0x9d0] sm:$0xff] %v708_v28  ;;  %1221 = vst [vmem:[%s1803_s17 + $0x9d8] sm:$0xff] %v709_v29  ;;  %v750_v28 = vunpack.c.l.bf16 %v316_v14  ;;  %v751_v29 = vunpack.c.h.bf16 %v316_v14  ;;  %v760_v42 = vunpack.c.l.bf16 %v321_v27  ;;  %v761_v43 = vunpack.c.h.bf16 %v321_v27 }
  0xd6   : > { %1222 = vst [vmem:[%s1803_s17 + $0x9e0] sm:$0xff] %v710_v32  ;;  %1223 = vst [vmem:[%s1803_s17 + $0x9e8] sm:$0xff] %v711_v33  ;;  %v322_v32 = vld [vmem:[%s1787_s30 + $0x5c0] sm:$0xff]  ;;  %v323_v33 = vld [vmem:[%s1787_s30 + $0x5c8] sm:$0xff] }
  0xd7   : > { %1224 = vst [vmem:[%s1803_s17 + $0x9f0] sm:$0xff] %v712_v34  ;;  %1225 = vst [vmem:[%s1803_s17 + $0x9f8] sm:$0xff] %v713_v35  ;;  %v754_v34 = vunpack.c.l.bf16 %v318_v20  ;;  %v755_v35 = vunpack.c.h.bf16 %v318_v20  ;;  %v764_v48 = vunpack.c.l.bf16 %v323_v33  ;;  %v765_v49 = vunpack.c.h.bf16 %v323_v33 }
  0xd8   : > { %1226 = vst [vmem:[%s1803_s17 + $0xa00] sm:$0xff] %v714_v38  ;;  %1227 = vst [vmem:[%s1803_s17 + $0xa08] sm:$0xff] %v715_v39  ;;  %v324_v38 = vld [vmem:[%s1787_s30 + $0x5d0] sm:$0xff]  ;;  %v325_v39 = vld [vmem:[%s1787_s30 + $0x5d8] sm:$0xff] }
  0xd9   : > { %1228 = vst [vmem:[%s1803_s17 + $0xa10] sm:$0xff] %v716_v40  ;;  %1229 = vst [vmem:[%s1803_s17 + $0xa18] sm:$0xff] %v717_v41  ;;  %v758_v40 = vunpack.c.l.bf16 %v320_v26  ;;  %v759_v41 = vunpack.c.h.bf16 %v320_v26  ;;  %v768_v54 = vunpack.c.l.bf16 %v325_v39  ;;  %v769_v55 = vunpack.c.h.bf16 %v325_v39 }
  0xda   : > { %1230 = vst [vmem:[%s1803_s17 + $0xa20] sm:$0xff] %v718_v44  ;;  %1231 = vst [vmem:[%s1803_s17 + $0xa28] sm:$0xff] %v719_v45  ;;  %v326_v44 = vld [vmem:[%s1787_s30 + $0x5e0] sm:$0xff]  ;;  %v327_v45 = vld [vmem:[%s1787_s30 + $0x5e8] sm:$0xff] }
  0xdb   : > { %1232 = vst [vmem:[%s1803_s17 + $0xa30] sm:$0xff] %v720_v46  ;;  %1233 = vst [vmem:[%s1803_s17 + $0xa38] sm:$0xff] %v721_v47  ;;  %v762_v46 = vunpack.c.l.bf16 %v322_v32  ;;  %v763_v47 = vunpack.c.h.bf16 %v322_v32  ;;  %v772_v60 = vunpack.c.l.bf16 %v327_v45  ;;  %v773_v61 = vunpack.c.h.bf16 %v327_v45 }
  0xdc   : > { %1234 = vst [vmem:[%s1803_s17 + $0xa40] sm:$0xff] %v722_v50  ;;  %1235 = vst [vmem:[%s1803_s17 + $0xa48] sm:$0xff] %v723_v51  ;;  %v328_v50 = vld [vmem:[%s1787_s30 + $0x5f0] sm:$0xff]  ;;  %v329_v51 = vld [vmem:[%s1787_s30 + $0x5f8] sm:$0xff] }
  0xdd   : > { %1236 = vst [vmem:[%s1803_s17 + $0xa50] sm:$0xff] %v724_v52  ;;  %1237 = vst [vmem:[%s1803_s17 + $0xa58] sm:$0xff] %v725_v53  ;;  %v766_v52 = vunpack.c.l.bf16 %v324_v38  ;;  %v767_v53 = vunpack.c.h.bf16 %v324_v38  ;;  %v776_v2 = vunpack.c.l.bf16 %v329_v51  ;;  %v777_v3 = vunpack.c.h.bf16 %v329_v51 }
  0xde   : > { %1238 = vst [vmem:[%s1803_s17 + $0xa60] sm:$0xff] %v726_v56  ;;  %1239 = vst [vmem:[%s1803_s17 + $0xa68] sm:$0xff] %v727_v57  ;;  %v330_v56 = vld [vmem:[%s1787_s30 + $0x600] sm:$0xff]  ;;  %v331_v57 = vld [vmem:[%s1787_s30 + $0x608] sm:$0xff] }
  0xdf   : > { %1240 = vst [vmem:[%s1803_s17 + $0xa70] sm:$0xff] %v728_v58  ;;  %1241 = vst [vmem:[%s1803_s17 + $0xa78] sm:$0xff] %v729_v59  ;;  %v770_v58 = vunpack.c.l.bf16 %v326_v44  ;;  %v771_v59 = vunpack.c.h.bf16 %v326_v44  ;;  %v780_v8 = vunpack.c.l.bf16 %v331_v57  ;;  %v781_v9 = vunpack.c.h.bf16 %v331_v57 }
  0xe0   : > { %1242 = vst [vmem:[%s1803_s17 + $0xa80] sm:$0xff] %v730_v62  ;;  %1243 = vst [vmem:[%s1803_s17 + $0xa88] sm:$0xff] %v731_v63  ;;  %v332_v62 = vld [vmem:[%s1787_s30 + $0x610] sm:$0xff]  ;;  %v333_v63 = vld [vmem:[%s1787_s30 + $0x618] sm:$0xff] }
  0xe1   : > { %1244 = vst [vmem:[%s1803_s17 + $0xa90] sm:$0xff] %v732_v0  ;;  %1245 = vst [vmem:[%s1803_s17 + $0xa98] sm:$0xff] %v733_v1  ;;  %v774_v0 = vunpack.c.l.bf16 %v328_v50  ;;  %v775_v1 = vunpack.c.h.bf16 %v328_v50  ;;  %v784_v14 = vunpack.c.l.bf16 %v333_v63  ;;  %v785_v15 = vunpack.c.h.bf16 %v333_v63 }
  0xe2   : > { %1246 = vst [vmem:[%s1803_s17 + $0xaa0] sm:$0xff] %v734_v4  ;;  %1247 = vst [vmem:[%s1803_s17 + $0xaa8] sm:$0xff] %v735_v5  ;;  %v334_v4 = vld [vmem:[%s1787_s30 + $0x620] sm:$0xff]  ;;  %v335_v5 = vld [vmem:[%s1787_s30 + $0x628] sm:$0xff] }
  0xe3   : > { %1248 = vst [vmem:[%s1803_s17 + $0xab0] sm:$0xff] %v736_v6  ;;  %1249 = vst [vmem:[%s1803_s17 + $0xab8] sm:$0xff] %v737_v7  ;;  %v778_v6 = vunpack.c.l.bf16 %v330_v56  ;;  %v779_v7 = vunpack.c.h.bf16 %v330_v56  ;;  %v788_v20 = vunpack.c.l.bf16 %v335_v5  ;;  %v789_v21 = vunpack.c.h.bf16 %v335_v5 }
  0xe4   : > { %1250 = vst [vmem:[%s1803_s17 + $0xac0] sm:$0xff] %v738_v10  ;;  %1251 = vst [vmem:[%s1803_s17 + $0xac8] sm:$0xff] %v739_v11  ;;  %v336_v10 = vld [vmem:[%s1787_s30 + $0x630] sm:$0xff]  ;;  %v337_v11 = vld [vmem:[%s1787_s30 + $0x638] sm:$0xff] }
  0xe5   : > { %1252 = vst [vmem:[%s1803_s17 + $0xad0] sm:$0xff] %v740_v12  ;;  %1253 = vst [vmem:[%s1803_s17 + $0xad8] sm:$0xff] %v741_v13  ;;  %v782_v12 = vunpack.c.l.bf16 %v332_v62  ;;  %v783_v13 = vunpack.c.h.bf16 %v332_v62  ;;  %v792_v26 = vunpack.c.l.bf16 %v337_v11  ;;  %v793_v27 = vunpack.c.h.bf16 %v337_v11 }
  0xe6   : > { %1254 = vst [vmem:[%s1803_s17 + $0xae0] sm:$0xff] %v742_v16  ;;  %1255 = vst [vmem:[%s1803_s17 + $0xae8] sm:$0xff] %v743_v17  ;;  %v338_v16 = vld [vmem:[%s1787_s30 + $0x640] sm:$0xff]  ;;  %v339_v17 = vld [vmem:[%s1787_s30 + $0x648] sm:$0xff] }
  0xe7   : > { %1256 = vst [vmem:[%s1803_s17 + $0xaf0] sm:$0xff] %v744_v18  ;;  %1257 = vst [vmem:[%s1803_s17 + $0xaf8] sm:$0xff] %v745_v19  ;;  %v786_v18 = vunpack.c.l.bf16 %v334_v4  ;;  %v787_v19 = vunpack.c.h.bf16 %v334_v4  ;;  %v796_v32 = vunpack.c.l.bf16 %v339_v17  ;;  %v797_v33 = vunpack.c.h.bf16 %v339_v17 }
  0xe8   : > { %1258 = vst [vmem:[%s1803_s17 + $0xb00] sm:$0xff] %v746_v22  ;;  %1259 = vst [vmem:[%s1803_s17 + $0xb08] sm:$0xff] %v747_v23  ;;  %v340_v22 = vld [vmem:[%s1787_s30 + $0x650] sm:$0xff]  ;;  %v341_v23 = vld [vmem:[%s1787_s30 + $0x658] sm:$0xff] }
  0xe9   : > { %1260 = vst [vmem:[%s1803_s17 + $0xb10] sm:$0xff] %v748_v24  ;;  %1261 = vst [vmem:[%s1803_s17 + $0xb18] sm:$0xff] %v749_v25  ;;  %v790_v24 = vunpack.c.l.bf16 %v336_v10  ;;  %v791_v25 = vunpack.c.h.bf16 %v336_v10  ;;  %v800_v38 = vunpack.c.l.bf16 %v341_v23  ;;  %v801_v39 = vunpack.c.h.bf16 %v341_v23 }
  0xea   : > { %1262 = vst [vmem:[%s1803_s17 + $0xb20] sm:$0xff] %v750_v28  ;;  %1263 = vst [vmem:[%s1803_s17 + $0xb28] sm:$0xff] %v751_v29  ;;  %v342_v28 = vld [vmem:[%s1787_s30 + $0x660] sm:$0xff]  ;;  %v343_v29 = vld [vmem:[%s1787_s30 + $0x668] sm:$0xff] }
  0xeb   : > { %1264 = vst [vmem:[%s1803_s17 + $0xb30] sm:$0xff] %v752_v30  ;;  %1265 = vst [vmem:[%s1803_s17 + $0xb38] sm:$0xff] %v753_v31  ;;  %v794_v30 = vunpack.c.l.bf16 %v338_v16  ;;  %v795_v31 = vunpack.c.h.bf16 %v338_v16  ;;  %v804_v44 = vunpack.c.l.bf16 %v343_v29  ;;  %v805_v45 = vunpack.c.h.bf16 %v343_v29 }
  0xec   : > { %1266 = vst [vmem:[%s1803_s17 + $0xb40] sm:$0xff] %v754_v34  ;;  %1267 = vst [vmem:[%s1803_s17 + $0xb48] sm:$0xff] %v755_v35  ;;  %v344_v34 = vld [vmem:[%s1787_s30 + $0x670] sm:$0xff]  ;;  %v345_v35 = vld [vmem:[%s1787_s30 + $0x678] sm:$0xff] }
  0xed   : > { %1268 = vst [vmem:[%s1803_s17 + $0xb50] sm:$0xff] %v756_v36  ;;  %1269 = vst [vmem:[%s1803_s17 + $0xb58] sm:$0xff] %v757_v37  ;;  %v798_v36 = vunpack.c.l.bf16 %v340_v22  ;;  %v799_v37 = vunpack.c.h.bf16 %v340_v22  ;;  %v808_v50 = vunpack.c.l.bf16 %v345_v35  ;;  %v809_v51 = vunpack.c.h.bf16 %v345_v35 }
  0xee   : > { %1270 = vst [vmem:[%s1803_s17 + $0xb60] sm:$0xff] %v758_v40  ;;  %1271 = vst [vmem:[%s1803_s17 + $0xb68] sm:$0xff] %v759_v41  ;;  %v346_v40 = vld [vmem:[%s1787_s30 + $0x680] sm:$0xff]  ;;  %v347_v41 = vld [vmem:[%s1787_s30 + $0x688] sm:$0xff] }
  0xef   : > { %1272 = vst [vmem:[%s1803_s17 + $0xb70] sm:$0xff] %v760_v42  ;;  %1273 = vst [vmem:[%s1803_s17 + $0xb78] sm:$0xff] %v761_v43  ;;  %v802_v42 = vunpack.c.l.bf16 %v342_v28  ;;  %v803_v43 = vunpack.c.h.bf16 %v342_v28  ;;  %v812_v56 = vunpack.c.l.bf16 %v347_v41  ;;  %v813_v57 = vunpack.c.h.bf16 %v347_v41 }
  0xf0   : > { %1274 = vst [vmem:[%s1803_s17 + $0xb80] sm:$0xff] %v762_v46  ;;  %1275 = vst [vmem:[%s1803_s17 + $0xb88] sm:$0xff] %v763_v47  ;;  %v348_v46 = vld [vmem:[%s1787_s30 + $0x690] sm:$0xff]  ;;  %v349_v47 = vld [vmem:[%s1787_s30 + $0x698] sm:$0xff] }
  0xf1   : > { %1276 = vst [vmem:[%s1803_s17 + $0xb90] sm:$0xff] %v764_v48  ;;  %1277 = vst [vmem:[%s1803_s17 + $0xb98] sm:$0xff] %v765_v49  ;;  %v806_v48 = vunpack.c.l.bf16 %v344_v34  ;;  %v807_v49 = vunpack.c.h.bf16 %v344_v34  ;;  %v816_v62 = vunpack.c.l.bf16 %v349_v47  ;;  %v817_v63 = vunpack.c.h.bf16 %v349_v47 }
  0xf2   : > { %1278 = vst [vmem:[%s1803_s17 + $0xba0] sm:$0xff] %v766_v52  ;;  %1279 = vst [vmem:[%s1803_s17 + $0xba8] sm:$0xff] %v767_v53  ;;  %v350_v52 = vld [vmem:[%s1787_s30 + $0x6a0] sm:$0xff]  ;;  %v351_v53 = vld [vmem:[%s1787_s30 + $0x6a8] sm:$0xff] }
  0xf3   : > { %1280 = vst [vmem:[%s1803_s17 + $0xbb0] sm:$0xff] %v768_v54  ;;  %1281 = vst [vmem:[%s1803_s17 + $0xbb8] sm:$0xff] %v769_v55  ;;  %v810_v54 = vunpack.c.l.bf16 %v346_v40  ;;  %v811_v55 = vunpack.c.h.bf16 %v346_v40  ;;  %v820_v4 = vunpack.c.l.bf16 %v351_v53  ;;  %v821_v5 = vunpack.c.h.bf16 %v351_v53 }
  0xf4   : > { %1282 = vst [vmem:[%s1803_s17 + $0xbc0] sm:$0xff] %v770_v58  ;;  %1283 = vst [vmem:[%s1803_s17 + $0xbc8] sm:$0xff] %v771_v59  ;;  %v352_v58 = vld [vmem:[%s1787_s30 + $0x6b0] sm:$0xff]  ;;  %v353_v59 = vld [vmem:[%s1787_s30 + $0x6b8] sm:$0xff] }
  0xf5   : > { %1284 = vst [vmem:[%s1803_s17 + $0xbd0] sm:$0xff] %v772_v60  ;;  %1285 = vst [vmem:[%s1803_s17 + $0xbd8] sm:$0xff] %v773_v61  ;;  %v814_v60 = vunpack.c.l.bf16 %v348_v46  ;;  %v815_v61 = vunpack.c.h.bf16 %v348_v46  ;;  %v824_v10 = vunpack.c.l.bf16 %v353_v59  ;;  %v825_v11 = vunpack.c.h.bf16 %v353_v59 }
  0xf6   : > { %1286 = vst [vmem:[%s1803_s17 + $0xbe0] sm:$0xff] %v774_v0  ;;  %1287 = vst [vmem:[%s1803_s17 + $0xbe8] sm:$0xff] %v775_v1  ;;  %v354_v0 = vld [vmem:[%s1787_s30 + $0x6c0] sm:$0xff]  ;;  %v355_v1 = vld [vmem:[%s1787_s30 + $0x6c8] sm:$0xff] }
  0xf7   : > { %1288 = vst [vmem:[%s1803_s17 + $0xbf0] sm:$0xff] %v776_v2  ;;  %1289 = vst [vmem:[%s1803_s17 + $0xbf8] sm:$0xff] %v777_v3  ;;  %v818_v2 = vunpack.c.l.bf16 %v350_v52  ;;  %v819_v3 = vunpack.c.h.bf16 %v350_v52  ;;  %v828_v16 = vunpack.c.l.bf16 %v355_v1  ;;  %v829_v17 = vunpack.c.h.bf16 %v355_v1 }
  0xf8   : > { %1290 = vst [vmem:[%s1803_s17 + $0xc00] sm:$0xff] %v778_v6  ;;  %1291 = vst [vmem:[%s1803_s17 + $0xc08] sm:$0xff] %v779_v7  ;;  %v356_v6 = vld [vmem:[%s1787_s30 + $0x6d0] sm:$0xff]  ;;  %v357_v7 = vld [vmem:[%s1787_s30 + $0x6d8] sm:$0xff] }
  0xf9   : > { %1292 = vst [vmem:[%s1803_s17 + $0xc10] sm:$0xff] %v780_v8  ;;  %1293 = vst [vmem:[%s1803_s17 + $0xc18] sm:$0xff] %v781_v9  ;;  %v822_v8 = vunpack.c.l.bf16 %v352_v58  ;;  %v823_v9 = vunpack.c.h.bf16 %v352_v58  ;;  %v832_v22 = vunpack.c.l.bf16 %v357_v7  ;;  %v833_v23 = vunpack.c.h.bf16 %v357_v7 }
  0xfa   : > { %1294 = vst [vmem:[%s1803_s17 + $0xc20] sm:$0xff] %v782_v12  ;;  %1295 = vst [vmem:[%s1803_s17 + $0xc28] sm:$0xff] %v783_v13  ;;  %v358_v12 = vld [vmem:[%s1787_s30 + $0x6e0] sm:$0xff]  ;;  %v359_v13 = vld [vmem:[%s1787_s30 + $0x6e8] sm:$0xff] }
  0xfb   : > { %1296 = vst [vmem:[%s1803_s17 + $0xc30] sm:$0xff] %v784_v14  ;;  %1297 = vst [vmem:[%s1803_s17 + $0xc38] sm:$0xff] %v785_v15  ;;  %v826_v14 = vunpack.c.l.bf16 %v354_v0  ;;  %v827_v15 = vunpack.c.h.bf16 %v354_v0  ;;  %v836_v28 = vunpack.c.l.bf16 %v359_v13  ;;  %v837_v29 = vunpack.c.h.bf16 %v359_v13 }
  0xfc   : > { %1298 = vst [vmem:[%s1803_s17 + $0xc40] sm:$0xff] %v786_v18  ;;  %1299 = vst [vmem:[%s1803_s17 + $0xc48] sm:$0xff] %v787_v19  ;;  %v360_v18 = vld [vmem:[%s1787_s30 + $0x6f0] sm:$0xff]  ;;  %v361_v19 = vld [vmem:[%s1787_s30 + $0x6f8] sm:$0xff] }
  0xfd   : > { %1300 = vst [vmem:[%s1803_s17 + $0xc50] sm:$0xff] %v788_v20  ;;  %1301 = vst [vmem:[%s1803_s17 + $0xc58] sm:$0xff] %v789_v21  ;;  %v830_v20 = vunpack.c.l.bf16 %v356_v6  ;;  %v831_v21 = vunpack.c.h.bf16 %v356_v6  ;;  %v840_v34 = vunpack.c.l.bf16 %v361_v19  ;;  %v841_v35 = vunpack.c.h.bf16 %v361_v19 }
  0xfe   : > { %1302 = vst [vmem:[%s1803_s17 + $0xc60] sm:$0xff] %v790_v24  ;;  %1303 = vst [vmem:[%s1803_s17 + $0xc68] sm:$0xff] %v791_v25  ;;  %v362_v24 = vld [vmem:[%s1787_s30 + $0x700] sm:$0xff]  ;;  %v363_v25 = vld [vmem:[%s1787_s30 + $0x708] sm:$0xff] }
  0xff   : > { %1304 = vst [vmem:[%s1803_s17 + $0xc70] sm:$0xff] %v792_v26  ;;  %1305 = vst [vmem:[%s1803_s17 + $0xc78] sm:$0xff] %v793_v27  ;;  %v834_v26 = vunpack.c.l.bf16 %v358_v12  ;;  %v835_v27 = vunpack.c.h.bf16 %v358_v12  ;;  %v844_v40 = vunpack.c.l.bf16 %v363_v25  ;;  %v845_v41 = vunpack.c.h.bf16 %v363_v25 }
 0x100   : > { %1306 = vst [vmem:[%s1803_s17 + $0xc80] sm:$0xff] %v794_v30  ;;  %1307 = vst [vmem:[%s1803_s17 + $0xc88] sm:$0xff] %v795_v31  ;;  %v364_v30 = vld [vmem:[%s1787_s30 + $0x710] sm:$0xff]  ;;  %v365_v31 = vld [vmem:[%s1787_s30 + $0x718] sm:$0xff] }
 0x101   : > { %1308 = vst [vmem:[%s1803_s17 + $0xc90] sm:$0xff] %v796_v32  ;;  %1309 = vst [vmem:[%s1803_s17 + $0xc98] sm:$0xff] %v797_v33  ;;  %v838_v32 = vunpack.c.l.bf16 %v360_v18  ;;  %v839_v33 = vunpack.c.h.bf16 %v360_v18  ;;  %v848_v46 = vunpack.c.l.bf16 %v365_v31  ;;  %v849_v47 = vunpack.c.h.bf16 %v365_v31 }
 0x102   : > { %1310 = vst [vmem:[%s1803_s17 + $0xca0] sm:$0xff] %v798_v36  ;;  %1311 = vst [vmem:[%s1803_s17 + $0xca8] sm:$0xff] %v799_v37  ;;  %v366_v36 = vld [vmem:[%s1787_s30 + $0x720] sm:$0xff]  ;;  %v367_v37 = vld [vmem:[%s1787_s30 + $0x728] sm:$0xff] }
 0x103   : > { %1312 = vst [vmem:[%s1803_s17 + $0xcb0] sm:$0xff] %v800_v38  ;;  %1313 = vst [vmem:[%s1803_s17 + $0xcb8] sm:$0xff] %v801_v39  ;;  %v842_v38 = vunpack.c.l.bf16 %v362_v24  ;;  %v843_v39 = vunpack.c.h.bf16 %v362_v24  ;;  %v852_v52 = vunpack.c.l.bf16 %v367_v37  ;;  %v853_v53 = vunpack.c.h.bf16 %v367_v37 }
 0x104   : > { %1314 = vst [vmem:[%s1803_s17 + $0xcc0] sm:$0xff] %v802_v42  ;;  %1315 = vst [vmem:[%s1803_s17 + $0xcc8] sm:$0xff] %v803_v43  ;;  %v368_v42 = vld [vmem:[%s1787_s30 + $0x730] sm:$0xff]  ;;  %v369_v43 = vld [vmem:[%s1787_s30 + $0x738] sm:$0xff] }
 0x105   : > { %1316 = vst [vmem:[%s1803_s17 + $0xcd0] sm:$0xff] %v804_v44  ;;  %1317 = vst [vmem:[%s1803_s17 + $0xcd8] sm:$0xff] %v805_v45  ;;  %v846_v44 = vunpack.c.l.bf16 %v364_v30  ;;  %v847_v45 = vunpack.c.h.bf16 %v364_v30  ;;  %v856_v58 = vunpack.c.l.bf16 %v369_v43  ;;  %v857_v59 = vunpack.c.h.bf16 %v369_v43 }
 0x106   : > { %1318 = vst [vmem:[%s1803_s17 + $0xce0] sm:$0xff] %v806_v48  ;;  %1319 = vst [vmem:[%s1803_s17 + $0xce8] sm:$0xff] %v807_v49  ;;  %v370_v48 = vld [vmem:[%s1787_s30 + $0x740] sm:$0xff]  ;;  %v371_v49 = vld [vmem:[%s1787_s30 + $0x748] sm:$0xff] }
 0x107   : > { %1320 = vst [vmem:[%s1803_s17 + $0xcf0] sm:$0xff] %v808_v50  ;;  %1321 = vst [vmem:[%s1803_s17 + $0xcf8] sm:$0xff] %v809_v51  ;;  %v850_v50 = vunpack.c.l.bf16 %v366_v36  ;;  %v851_v51 = vunpack.c.h.bf16 %v366_v36  ;;  %v860_v0 = vunpack.c.l.bf16 %v371_v49  ;;  %v861_v1 = vunpack.c.h.bf16 %v371_v49 }
 0x108   : > { %1322 = vst [vmem:[%s1803_s17 + $0xd00] sm:$0xff] %v810_v54  ;;  %1323 = vst [vmem:[%s1803_s17 + $0xd08] sm:$0xff] %v811_v55  ;;  %v372_v54 = vld [vmem:[%s1787_s30 + $0x750] sm:$0xff]  ;;  %v373_v55 = vld [vmem:[%s1787_s30 + $0x758] sm:$0xff] }
 0x109   : > { %1324 = vst [vmem:[%s1803_s17 + $0xd10] sm:$0xff] %v812_v56  ;;  %1325 = vst [vmem:[%s1803_s17 + $0xd18] sm:$0xff] %v813_v57  ;;  %v854_v56 = vunpack.c.l.bf16 %v368_v42  ;;  %v855_v57 = vunpack.c.h.bf16 %v368_v42  ;;  %v864_v6 = vunpack.c.l.bf16 %v373_v55  ;;  %v865_v7 = vunpack.c.h.bf16 %v373_v55 }
 0x10a   : > { %1326 = vst [vmem:[%s1803_s17 + $0xd20] sm:$0xff] %v814_v60  ;;  %1327 = vst [vmem:[%s1803_s17 + $0xd28] sm:$0xff] %v815_v61  ;;  %v374_v60 = vld [vmem:[%s1787_s30 + $0x760] sm:$0xff]  ;;  %v375_v61 = vld [vmem:[%s1787_s30 + $0x768] sm:$0xff] }
 0x10b   : > { %1328 = vst [vmem:[%s1803_s17 + $0xd30] sm:$0xff] %v816_v62  ;;  %1329 = vst [vmem:[%s1803_s17 + $0xd38] sm:$0xff] %v817_v63  ;;  %v858_v62 = vunpack.c.l.bf16 %v370_v48  ;;  %v859_v63 = vunpack.c.h.bf16 %v370_v48  ;;  %v868_v12 = vunpack.c.l.bf16 %v375_v61  ;;  %v869_v13 = vunpack.c.h.bf16 %v375_v61 }
 0x10c   : > { %1330 = vst [vmem:[%s1803_s17 + $0xd40] sm:$0xff] %v818_v2  ;;  %1331 = vst [vmem:[%s1803_s17 + $0xd48] sm:$0xff] %v819_v3  ;;  %v376_v2 = vld [vmem:[%s1787_s30 + $0x770] sm:$0xff]  ;;  %v377_v3 = vld [vmem:[%s1787_s30 + $0x778] sm:$0xff] }
 0x10d   : > { %1332 = vst [vmem:[%s1803_s17 + $0xd50] sm:$0xff] %v820_v4  ;;  %1333 = vst [vmem:[%s1803_s17 + $0xd58] sm:$0xff] %v821_v5  ;;  %v862_v4 = vunpack.c.l.bf16 %v372_v54  ;;  %v863_v5 = vunpack.c.h.bf16 %v372_v54  ;;  %v872_v18 = vunpack.c.l.bf16 %v377_v3  ;;  %v873_v19 = vunpack.c.h.bf16 %v377_v3 }
 0x10e   : > { %1334 = vst [vmem:[%s1803_s17 + $0xd60] sm:$0xff] %v822_v8  ;;  %1335 = vst [vmem:[%s1803_s17 + $0xd68] sm:$0xff] %v823_v9  ;;  %v378_v8 = vld [vmem:[%s1787_s30 + $0x780] sm:$0xff]  ;;  %v379_v9 = vld [vmem:[%s1787_s30 + $0x788] sm:$0xff] }
 0x10f   : > { %1336 = vst [vmem:[%s1803_s17 + $0xd70] sm:$0xff] %v824_v10  ;;  %1337 = vst [vmem:[%s1803_s17 + $0xd78] sm:$0xff] %v825_v11  ;;  %v866_v10 = vunpack.c.l.bf16 %v374_v60  ;;  %v867_v11 = vunpack.c.h.bf16 %v374_v60  ;;  %v876_v24 = vunpack.c.l.bf16 %v379_v9  ;;  %v877_v25 = vunpack.c.h.bf16 %v379_v9 }
 0x110   : > { %1338 = vst [vmem:[%s1803_s17 + $0xd80] sm:$0xff] %v826_v14  ;;  %1339 = vst [vmem:[%s1803_s17 + $0xd88] sm:$0xff] %v827_v15  ;;  %v380_v14 = vld [vmem:[%s1787_s30 + $0x790] sm:$0xff]  ;;  %v381_v15 = vld [vmem:[%s1787_s30 + $0x798] sm:$0xff] }
 0x111   : > { %1340 = vst [vmem:[%s1803_s17 + $0xd90] sm:$0xff] %v828_v16  ;;  %1341 = vst [vmem:[%s1803_s17 + $0xd98] sm:$0xff] %v829_v17  ;;  %v870_v16 = vunpack.c.l.bf16 %v376_v2  ;;  %v871_v17 = vunpack.c.h.bf16 %v376_v2  ;;  %v880_v30 = vunpack.c.l.bf16 %v381_v15  ;;  %v881_v31 = vunpack.c.h.bf16 %v381_v15 }
 0x112   : > { %1342 = vst [vmem:[%s1803_s17 + $0xda0] sm:$0xff] %v830_v20  ;;  %1343 = vst [vmem:[%s1803_s17 + $0xda8] sm:$0xff] %v831_v21  ;;  %v382_v20 = vld [vmem:[%s1787_s30 + $0x7a0] sm:$0xff]  ;;  %v383_v21 = vld [vmem:[%s1787_s30 + $0x7a8] sm:$0xff] }
 0x113   : > { %1344 = vst [vmem:[%s1803_s17 + $0xdb0] sm:$0xff] %v832_v22  ;;  %1345 = vst [vmem:[%s1803_s17 + $0xdb8] sm:$0xff] %v833_v23  ;;  %v874_v22 = vunpack.c.l.bf16 %v378_v8  ;;  %v875_v23 = vunpack.c.h.bf16 %v378_v8  ;;  %v884_v36 = vunpack.c.l.bf16 %v383_v21  ;;  %v885_v37 = vunpack.c.h.bf16 %v383_v21 }
 0x114   : > { %1346 = vst [vmem:[%s1803_s17 + $0xdc0] sm:$0xff] %v834_v26  ;;  %1347 = vst [vmem:[%s1803_s17 + $0xdc8] sm:$0xff] %v835_v27  ;;  %v384_v26 = vld [vmem:[%s1787_s30 + $0x7b0] sm:$0xff]  ;;  %v385_v27 = vld [vmem:[%s1787_s30 + $0x7b8] sm:$0xff] }
 0x115   : > { %1348 = vst [vmem:[%s1803_s17 + $0xdd0] sm:$0xff] %v836_v28  ;;  %1349 = vst [vmem:[%s1803_s17 + $0xdd8] sm:$0xff] %v837_v29  ;;  %v878_v28 = vunpack.c.l.bf16 %v380_v14  ;;  %v879_v29 = vunpack.c.h.bf16 %v380_v14  ;;  %v888_v42 = vunpack.c.l.bf16 %v385_v27  ;;  %v889_v43 = vunpack.c.h.bf16 %v385_v27 }
 0x116   : > { %1350 = vst [vmem:[%s1803_s17 + $0xde0] sm:$0xff] %v838_v32  ;;  %1351 = vst [vmem:[%s1803_s17 + $0xde8] sm:$0xff] %v839_v33  ;;  %v386_v32 = vld [vmem:[%s1787_s30 + $0x7c0] sm:$0xff]  ;;  %v387_v33 = vld [vmem:[%s1787_s30 + $0x7c8] sm:$0xff] }
 0x117   : > { %1352 = vst [vmem:[%s1803_s17 + $0xdf0] sm:$0xff] %v840_v34  ;;  %1353 = vst [vmem:[%s1803_s17 + $0xdf8] sm:$0xff] %v841_v35  ;;  %v882_v34 = vunpack.c.l.bf16 %v382_v20  ;;  %v883_v35 = vunpack.c.h.bf16 %v382_v20  ;;  %v892_v48 = vunpack.c.l.bf16 %v387_v33  ;;  %v893_v49 = vunpack.c.h.bf16 %v387_v33 }
 0x118   : > { %1354 = vst [vmem:[%s1803_s17 + $0xe00] sm:$0xff] %v842_v38  ;;  %1355 = vst [vmem:[%s1803_s17 + $0xe08] sm:$0xff] %v843_v39  ;;  %v388_v38 = vld [vmem:[%s1787_s30 + $0x7d0] sm:$0xff]  ;;  %v389_v39 = vld [vmem:[%s1787_s30 + $0x7d8] sm:$0xff] }
 0x119   : > { %1356 = vst [vmem:[%s1803_s17 + $0xe10] sm:$0xff] %v844_v40  ;;  %1357 = vst [vmem:[%s1803_s17 + $0xe18] sm:$0xff] %v845_v41  ;;  %v886_v40 = vunpack.c.l.bf16 %v384_v26  ;;  %v887_v41 = vunpack.c.h.bf16 %v384_v26  ;;  %v896_v54 = vunpack.c.l.bf16 %v389_v39  ;;  %v897_v55 = vunpack.c.h.bf16 %v389_v39 }
 0x11a   : > { %1358 = vst [vmem:[%s1803_s17 + $0xe20] sm:$0xff] %v846_v44  ;;  %1359 = vst [vmem:[%s1803_s17 + $0xe28] sm:$0xff] %v847_v45  ;;  %v390_v44 = vld [vmem:[%s1787_s30 + $0x7e0] sm:$0xff]  ;;  %v391_v45 = vld [vmem:[%s1787_s30 + $0x7e8] sm:$0xff] }
 0x11b   : > { %1360 = vst [vmem:[%s1803_s17 + $0xe30] sm:$0xff] %v848_v46  ;;  %1361 = vst [vmem:[%s1803_s17 + $0xe38] sm:$0xff] %v849_v47  ;;  %v890_v46 = vunpack.c.l.bf16 %v386_v32  ;;  %v891_v47 = vunpack.c.h.bf16 %v386_v32 }
 0x11c   : > { %1362 = vst [vmem:[%s1803_s17 + $0xe40] sm:$0xff] %v850_v50  ;;  %1363 = vst [vmem:[%s1803_s17 + $0xe48] sm:$0xff] %v851_v51  ;;  %v392_v50 = vld [vmem:[%s1787_s30 + $0x7f0] sm:$0xff]  ;;  %v393_v51 = vld [vmem:[%s1787_s30 + $0x7f8] sm:$0xff] }
 0x11d   : > { %1364 = vst [vmem:[%s1803_s17 + $0xe50] sm:$0xff] %v852_v52  ;;  %1365 = vst [vmem:[%s1803_s17 + $0xe58] sm:$0xff] %v853_v53  ;;  %v894_v52 = vunpack.c.l.bf16 %v388_v38  ;;  %v895_v53 = vunpack.c.h.bf16 %v388_v38  ;;  %v902_v60 = vunpack.c.l.bf16 %v392_v50  ;;  %v903_v61 = vunpack.c.h.bf16 %v392_v50 }
 0x11e   : > { %1366 = vst [vmem:[%s1803_s17 + $0xe60] sm:$0xff] %v854_v56  ;;  %1367 = vst [vmem:[%s1803_s17 + $0xe68] sm:$0xff] %v855_v57  ;;  %v898_v56 = vunpack.c.l.bf16 %v390_v44  ;;  %v899_v57 = vunpack.c.h.bf16 %v390_v44 }
 0x11f   : > { %1368 = vst [vmem:[%s1803_s17 + $0xe70] sm:$0xff] %v856_v58  ;;  %1369 = vst [vmem:[%s1803_s17 + $0xe78] sm:$0xff] %v857_v59  ;;  %v900_v58 = vunpack.c.l.bf16 %v391_v45  ;;  %v901_v59 = vunpack.c.h.bf16 %v391_v45 }
 0x120   : > { %1370 = vst [vmem:[%s1803_s17 + $0xe80] sm:$0xff] %v858_v62  ;;  %1371 = vst [vmem:[%s1803_s17 + $0xe88] sm:$0xff] %v859_v63  ;;  %v904_v62 = vunpack.c.l.bf16 %v393_v51  ;;  %v905_v63 = vunpack.c.h.bf16 %v393_v51 }
 0x121   : > { %1372 = vst [vmem:[%s1803_s17 + $0xe90] sm:$0xff] %v860_v0  ;;  %1373 = vst [vmem:[%s1803_s17 + $0xe98] sm:$0xff] %v861_v1 }
 0x122   : > { %1374 = vst [vmem:[%s1803_s17 + $0xea0] sm:$0xff] %v862_v4  ;;  %1375 = vst [vmem:[%s1803_s17 + $0xea8] sm:$0xff] %v863_v5 }
 0x123   : > { %1376 = vst [vmem:[%s1803_s17 + $0xeb0] sm:$0xff] %v864_v6  ;;  %1377 = vst [vmem:[%s1803_s17 + $0xeb8] sm:$0xff] %v865_v7 }
 0x124   : > { %1378 = vst [vmem:[%s1803_s17 + $0xec0] sm:$0xff] %v866_v10  ;;  %1379 = vst [vmem:[%s1803_s17 + $0xec8] sm:$0xff] %v867_v11 }
 0x125   : > { %1380 = vst [vmem:[%s1803_s17 + $0xed0] sm:$0xff] %v868_v12  ;;  %1381 = vst [vmem:[%s1803_s17 + $0xed8] sm:$0xff] %v869_v13 }
 0x126   : > { %1382 = vst [vmem:[%s1803_s17 + $0xee0] sm:$0xff] %v870_v16  ;;  %1383 = vst [vmem:[%s1803_s17 + $0xee8] sm:$0xff] %v871_v17 }
 0x127   : > { %1384 = vst [vmem:[%s1803_s17 + $0xef0] sm:$0xff] %v872_v18  ;;  %1385 = vst [vmem:[%s1803_s17 + $0xef8] sm:$0xff] %v873_v19 }
 0x128   : > { %1386 = vst [vmem:[%s1803_s17 + $0xf00] sm:$0xff] %v874_v22  ;;  %1387 = vst [vmem:[%s1803_s17 + $0xf08] sm:$0xff] %v875_v23 }
 0x129   : > { %1388 = vst [vmem:[%s1803_s17 + $0xf10] sm:$0xff] %v876_v24  ;;  %1389 = vst [vmem:[%s1803_s17 + $0xf18] sm:$0xff] %v877_v25 }
 0x12a   : > { %1390 = vst [vmem:[%s1803_s17 + $0xf20] sm:$0xff] %v878_v28  ;;  %1391 = vst [vmem:[%s1803_s17 + $0xf28] sm:$0xff] %v879_v29 }
 0x12b   : > { %1392 = vst [vmem:[%s1803_s17 + $0xf30] sm:$0xff] %v880_v30  ;;  %1393 = vst [vmem:[%s1803_s17 + $0xf38] sm:$0xff] %v881_v31 }
 0x12c   : > { %1394 = vst [vmem:[%s1803_s17 + $0xf40] sm:$0xff] %v882_v34  ;;  %1395 = vst [vmem:[%s1803_s17 + $0xf48] sm:$0xff] %v883_v35 }
 0x12d   : > { %1396 = vst [vmem:[%s1803_s17 + $0xf50] sm:$0xff] %v884_v36  ;;  %1397 = vst [vmem:[%s1803_s17 + $0xf58] sm:$0xff] %v885_v37 }
 0x12e   : > { %1398 = vst [vmem:[%s1803_s17 + $0xf60] sm:$0xff] %v886_v40  ;;  %1399 = vst [vmem:[%s1803_s17 + $0xf68] sm:$0xff] %v887_v41 }
 0x12f   : > { %1400 = vst [vmem:[%s1803_s17 + $0xf70] sm:$0xff] %v888_v42  ;;  %1401 = vst [vmem:[%s1803_s17 + $0xf78] sm:$0xff] %v889_v43 }
 0x130   : > { %1402 = vst [vmem:[%s1803_s17 + $0xf80] sm:$0xff] %v890_v46  ;;  %1403 = vst [vmem:[%s1803_s17 + $0xf88] sm:$0xff] %v891_v47 }
 0x131   : > { %1404 = vst [vmem:[%s1803_s17 + $0xf90] sm:$0xff] %v892_v48  ;;  %1405 = vst [vmem:[%s1803_s17 + $0xf98] sm:$0xff] %v893_v49 }
 0x132   : > { %1406 = vst [vmem:[%s1803_s17 + $0xfa0] sm:$0xff] %v894_v52  ;;  %1407 = vst [vmem:[%s1803_s17 + $0xfa8] sm:$0xff] %v895_v53 }
 0x133   : > { %1408 = vst [vmem:[%s1803_s17 + $0xfb0] sm:$0xff] %v896_v54  ;;  %1409 = vst [vmem:[%s1803_s17 + $0xfb8] sm:$0xff] %v897_v55 }
 0x134   : > { %1410 = vst [vmem:[%s1803_s17 + $0xfc0] sm:$0xff] %v898_v56  ;;  %1411 = vst [vmem:[%s1803_s17 + $0xfc8] sm:$0xff] %v899_v57 }
 0x135   : > { %1412 = vst [vmem:[%s1803_s17 + $0xfd0] sm:$0xff] %v900_v58  ;;  %1413 = vst [vmem:[%s1803_s17 + $0xfd8] sm:$0xff] %v901_v59 }
 0x136   : > { %1414 = vst [vmem:[%s1803_s17 + $0xfe0] sm:$0xff] %v902_v60  ;;  %1415 = vst [vmem:[%s1803_s17 + $0xfe8] sm:$0xff] %v903_v61 }
 0x137   : > { %1416 = vst [vmem:[%s1803_s17 + $0xff0] sm:$0xff] %v904_v62  ;;  %1417 = vst [vmem:[%s1803_s17 + $0xff8] sm:$0xff] %v905_v63 }
 0x138   : > { %1617 = shalt.err (!%p1614_p10)
}
 0x139   : > { %s1618_s14 = scalar_lea.hbm %s2557_s2, 65536  ;;  %s1622_s21 = scalar_lea.hbm %s2615_s1, 131072 }
 0x13a   : > { %p1619_p0 = scmp.ne.s32.totalorder %s2557_s2, %s1618_s14  ;;  %p1623_p1 = scmp.lt.s32.totalorder %s2557_s2, %s2615_s1 }
 0x13b   : > { %p1624_p3 = scmp.lt.s32.totalorder %s1622_s21, %s1618_s14 }
 0x13c   : > { %p1620_p2 = pnand %p1619_p0, %p2624_p12 }
 0x13d   : > { %p1625_p6 = por %p1624_p3, %p1623_p1 }
 0x13e   : > { %p1621_p9 = pneg %p1620_p2 }
 0x140   : > { %p1626_p11 = pnand %p1625_p6, %p1621_p9 }
 0x142   : > { %1629 = shalt.err (!%p1626_p11)
}
 0x143   : > { %s1674_s26 = smov 32768   ;;  %s1675_s30 = smov 2048  }
 0x144   : > { %1528 = dma.vmem_to_hbm [thread:$0]  (%p2624_p12), %s2559_s28, 65536, %s2557_s2, %s1419_s3, %s1674_s26, %s1674_s26, %s1675_s30  }
 0x145 PF: > { %s1448_s25 = sand.u32 1, %s1656_s6   ;;  %p2625_p13 = scmp.ne.s32.totalorder %s2621_s19, 0 }
 0x146   : > { %p2626_p4 = scmp.ge.s32.totalorder %s1668_s9, 2  ;;  %s1449_s17 = scalar_lea.sflag [#allocation4], %s1448_s25 }
 0x148   : > { %p1535_p5 = pnand %p2626_p4, %p2625_p13 }
 0x14a   : > { %p1536_p7 = pneg %p1535_p5 }
 0x14c   : > { %1651 = dma.done.wait (%p1536_p7), %s1449_s17, 65536  }
 0x14d   : > { %1653 = vsyncadd (%p1536_p7), %s1449_s17, 4294901760  ;;  %p14_p8 = scmp.ge.s32.totalorder %s1711_s12, 4   ;;  %s2627_s6 = smov %s1660_s7 }
 0x14e   : > { %s2628_s7 = smov %s1664_s8  ;;  %s2629_s8 = smov %s1723_s15 }
 0x14f   : > { %s2630_s9 = smov %s1711_s12  ;;  %16 = sbr.rel (!%p14_p8) target bundleno = 5 (0x5), region = 69 }
 0x154   :  { %1454 = vsyncpa [#allocation3], 1 }
 0x155   :  { %1456 = vsyncpa [#allocation3 + $0x1], 1 }
 0x156   :  { %1457 = vsyncpa [#allocation4], 1 }
 0x157   :  { %1459 = vsyncpa [#allocation4 + $0x1], 1 }

</bundles_post_ra>
